<compile_context>
chip_gen: v5e
topology: v5e:2x2
jax: 0.10.0
libtpu: 0.0.40
codegen_flags: <defaults>
</compile_context>

<pallas_src>
import math

import jax
import jax.numpy as jnp
import numpy as np
from jax import lax
from jax.experimental import pallas as pl
from jax.experimental.pallas import tpu as pltpu

EPS = 1e-5
INV_SQRT2 = 1.0 / math.sqrt(2.0)


# ------------------------------ Pallas kernel -------------------------------


def _make_kernel(tr, w_out, c, in_c):
    """Fused conv1 -> HerPN1 -> conv2 -> +shortcut -> HerPN2 for one row tile.

    tr    : number of final output rows produced per grid step
    w_out : output width (full width per tile)
    """
    we = w_out + 2            # h1 cols incl. conv2 halo
    m2 = tr * w_out           # output rows (flattened) per tile

    def kernel(xpt_ref, mask_ref, w1_ref, w2_ref, hp1_ref, hp2_ref, sc_ref,
               o_ref, h1s_ref):
        # ---- conv1: single K-folded matmul over the halo-extended grid.
        #      xpt: ((tr+2)*(w_out+2), 9*in_c) bf16, w1: (9*in_c, c) bf16.
        y = jnp.dot(xpt_ref[...], w1_ref[...],
                    preferred_element_type=jnp.float32)

        # ---- HerPN #1, pre-folded per-channel quadratic b0 + y*(b1 + b2*y).
        y = hp1_ref[0:1, :] + y * (hp1_ref[1:2, :] + hp1_ref[2:3, :] * y)

        # ---- zero the halo positions (== conv2's SAME zero padding).
        y = y * mask_ref[...]

        # ---- stage h1 (bf16) with spatial structure for the conv2 windows.
        h1s_ref[...] = y.reshape(tr + 2, we, c).astype(h1s_ref.dtype)

        # ---- conv2: 9 shifted windows folded into K -> one matmul.
        taps = []
        for kh in range(3):
            for kw in range(3):
                taps.append(
                    h1s_ref[kh:kh + tr, kw:kw + w_out, :].reshape(m2, c))
        p2 = jnp.concatenate(taps, axis=-1)                  # (m2, 9*c) bf16
        acc = jnp.dot(p2, w2_ref[...], preferred_element_type=jnp.float32)

        # ---- shortcut: strided input, zero channel extension done in-kernel.
        sc = sc_ref[...]
        if in_c < c:
            sc = jnp.concatenate(
                [sc, jnp.zeros((m2, c - in_c), sc.dtype)], axis=-1)
        acc = acc + sc

        # ---- HerPN #2.
        acc = hp2_ref[0:1, :] + acc * (hp2_ref[1:2, :] + hp2_ref[2:3, :] * acc)
        o_ref[...] = acc.astype(o_ref.dtype)

    return kernel


# ------------------------------ JAX wrapper ----------------------------------


def _fold_herpn(hp):
    """(5, C) [mean, var, a0, a1, a2] -> (3, C) quadratic coeffs [b0, b1, b2]."""
    mu, var, a0, a1, a2 = hp[0], hp[1], hp[2], hp[3], hp[4]
    t = lax.rsqrt(var + EPS)
    g2 = a2 * INV_SQRT2
    b2 = g2 * t * t
    b1 = a1 * t - 2.0 * b2 * mu
    b0 = a0 - a1 * t * mu + b2 * mu * mu - g2
    return jnp.stack([b0, b1, b2], axis=0).astype(jnp.float32)


def _conv1_patches_ext(x_nhwc, stride, h_out, w_out):
    """conv1 im2col on the conv2-halo-extended output grid, taps folded into K.

    Output positions (j, w) with j in [-1, h_out], w in [-1, w_out]; tap
    (kh, kw) reads x[stride*j + kh - 1, stride*w + kw - 1] (zero outside).
    Returns (N, h_out + 2, w_out + 2, 9 * Cin).
    """
    n, _, _, cin = x_nhwc.shape
    pad = stride + 1
    xp = jnp.pad(x_nhwc, ((0, 0), (pad, pad), (pad, pad), (0, 0)))
    he, we = h_out + 2, w_out + 2
    taps = []
    for kh in range(3):
        for kw in range(3):
            t = lax.slice(
                xp,
                (0, kh, kw, 0),
                (n, kh + stride * (he - 1) + 1, kw + stride * (we - 1) + 1, cin),
                (1, stride, stride, 1))
            taps.append(t)
    return jnp.concatenate(taps, axis=-1)


def _pick_row_tile(h_out, w_out, target_rows=512):
    """Largest divisor of h_out with tr*w_out <= target; prefer >=2 row tiles."""
    best = h_out
    for tr in range(h_out, 0, -1):
        if h_out % tr:
            continue
        if tr * w_out <= target_rows or tr == 1:
            best = tr
            break
    if best == h_out and h_out > 1:       # keep the grid >= 2 along rows
        for tr in range(h_out // 2, 0, -1):
            if h_out % tr == 0:
                best = tr
                break
    return best


def herpn_basic_block(x_nchw, params, stride=1):
    conv1_w = params["conv1_w"]            # (C, IN_C, 3, 3) PyTorch OIHW
    conv2_w = params["conv2_w"]            # (C, C, 3, 3)
    hp1, hp2 = params["hp1"], params["hp2"]  # (5, C) each

    c, in_c = conv1_w.shape[0], conv1_w.shape[1]
    n, _, h, w = x_nchw.shape
    h_out = (h - 1) // stride + 1
    w_out = (w - 1) // stride + 1

    tr = _pick_row_tile(h_out, w_out)
    r_tiles = h_out // tr
    we = w_out + 2
    ext_m = (tr + 2) * we                  # conv1 rows per tile (with halo)
    m2 = tr * w_out                        # output rows per tile

    # ---- layout glue (no math): NHWC activations, K-folded bf16 weights.
    x = jnp.transpose(x_nchw, (0, 2, 3, 1)).astype(jnp.float32)
    xb = x.astype(jnp.bfloat16)
    w1_k = jnp.transpose(conv1_w, (2, 3, 1, 0)).reshape(9 * in_c, c)
    w2_k = jnp.transpose(conv2_w, (2, 3, 1, 0)).reshape(9 * c, c)
    w1_k = w1_k.astype(jnp.bfloat16)
    w2_k = w2_k.astype(jnp.bfloat16)
    hp1_q = _fold_herpn(hp1)
    hp2_q = _fold_herpn(hp2)

    # ---- conv1 im2col (extended by conv2's halo), tiled over rows with halo.
    xp_ext = _conv1_patches_ext(xb, stride, h_out, w_out)
    xpt = jnp.stack(
        [lax.slice_in_dim(xp_ext, r * tr, r * tr + tr + 2, axis=1)
         for r in range(r_tiles)], axis=1)               # (N, R, tr+2, we, 9Ci)
    xpt = xpt.reshape(n, r_tiles, ext_m, 9 * in_c)

    # ---- halo validity mask (implements conv2's SAME zero padding exactly).
    rows = np.arange(r_tiles)[:, None] * tr - 1 + np.arange(tr + 2)[None, :]
    row_ok = (rows >= 0) & (rows < h_out)                      # (R, tr+2)
    cols = np.arange(we) - 1
    col_ok = (cols >= 0) & (cols < w_out)                      # (we,)
    mask = (row_ok[:, :, None] & col_ok[None, None, :]).astype(np.float32)
    mask = jnp.asarray(mask.reshape(r_tiles, ext_m, 1))

    # ---- shortcut: strided subsample only (channel extension is in-kernel).
    sc = x[:, ::stride, ::stride, :].reshape(n, r_tiles, m2, in_c)

    kernel = _make_kernel(tr, w_out, c, in_c)
    out = pl.pallas_call(
        kernel,
        out_shape=jax.ShapeDtypeStruct((n, r_tiles, m2, c), jnp.float32),
        grid=(n, r_tiles),
        in_specs=[
            pl.BlockSpec((None, None, ext_m, 9 * in_c),
                         lambda i, j: (i, j, 0, 0)),
            pl.BlockSpec((None, ext_m, 1), lambda i, j: (j, 0, 0)),
            pl.BlockSpec((9 * in_c, c), lambda i, j: (0, 0)),
            pl.BlockSpec((9 * c, c), lambda i, j: (0, 0)),
            pl.BlockSpec((3, c), lambda i, j: (0, 0)),
            pl.BlockSpec((3, c), lambda i, j: (0, 0)),
            pl.BlockSpec((None, None, m2, in_c), lambda i, j: (i, j, 0, 0)),
        ],
        out_specs=pl.BlockSpec((None, None, m2, c), lambda i, j: (i, j, 0, 0)),
        scratch_shapes=[pltpu.VMEM((tr + 2, we, c), jnp.bfloat16)],
        compiler_params=pltpu.CompilerParams(
            dimension_semantics=("parallel", "parallel")),
    )(xpt, mask, w1_k, w2_k, hp1_q, hp2_q, sc)

    out = out.reshape(n, h_out, w_out, c)
    return jnp.transpose(out, (0, 3, 1, 2))                    # back to NCHW


# --------------------------- pure-JAX reference ------------------------------


def _herpn_ref(x_nchw, hp):
    mu, var, a0, a1, a2 = [hp[i][None, :, None, None] for i in range(5)]
    xn = (x_nchw - mu) * lax.rsqrt(var + EPS)
    return a0 + a1 * xn + a2 * (xn * xn - 1.0) * INV_SQRT2


def herpn_basic_block_ref(x, params, stride=1):
    """f32 reference; conv inputs/weights quantized to bf16 like the kernel."""
    w1_pt, w2_pt = params["conv1_w"], params["conv2_w"]
    hp1, hp2 = params["hp1"], params["hp2"]
    c, in_c = w1_pt.shape[0], w1_pt.shape[1]
    dn = ("NCHW", "OIHW", "NCHW")
    bf = lambda a: a.astype(jnp.bfloat16).astype(jnp.float32)
    y = lax.conv_general_dilated(bf(x), bf(w1_pt), (stride, stride),
                                 ((1, 1), (1, 1)), dimension_numbers=dn,
                                 precision=lax.Precision.HIGHEST)
    y = _herpn_ref(y, hp1)
    y = lax.conv_general_dilated(bf(y), bf(w2_pt), (1, 1), ((1, 1), (1, 1)),
                                 dimension_numbers=dn,
                                 precision=lax.Precision.HIGHEST)
    sc = x[:, :, ::stride, ::stride]
    sc = jnp.pad(sc, ((0, 0), (0, c - in_c), (0, 0), (0, 0)))
    return _herpn_ref(sc + y, hp2)


# ------------------------------- init & main ---------------------------------


def _make_herpn_params(key, c):
    k1, k2, k3 = jax.random.split(key, 3)
    mu = 0.1 * jax.random.normal(k1, (c,), jnp.float32)
    var = 0.9 + 0.2 * jax.random.uniform(k2, (c,), jnp.float32)
    coeffs = (0.5 * jax.random.normal(k3, (3, c), jnp.float32)
              + jnp.array([[0.0], [1.0], [0.0]], jnp.float32))
    return jnp.concatenate([mu[None], var[None], coeffs], axis=0)  # (5, c)


def init_params(key, in_c, c):
    k1, k2, k3, k4 = jax.random.split(key, 4)
    return {
        "conv1_w": jax.random.normal(k1, (c, in_c, 3, 3), jnp.float32)
                   / np.sqrt(9.0 * in_c),
        "conv2_w": jax.random.normal(k2, (c, c, 3, 3), jnp.float32)
                   / np.sqrt(9.0 * c),
        "hp1": _make_herpn_params(k3, c),
        "hp2": _make_herpn_params(k4, c),
    }


if __name__ == "__main__":
    key = jax.random.PRNGKey(0)
    kx, kp = jax.random.split(key)

    N, IN_C, C, H, W = 2, 4, 8, 16, 16
    x = jax.random.normal(kx, (N, IN_C, H, W), jnp.float32)
    params = init_params(kp, IN_C, C)

    for stride in (1, 2):
        out = jax.block_until_ready(herpn_basic_block(x, params, stride=stride))
        ref = herpn_basic_block_ref(x, params, stride=stride)
        assert out.shape == ref.shape, (out.shape, ref.shape)
        # Convs run in bf16 (in both kernel and reference); the tolerance
        # covers rare bf16 re-quantization differences of the intermediate h1.
        if not bool(jnp.allclose(out, ref, atol=1e-2, rtol=1e-2)):
            raise SystemExit(
                f"mismatch at stride={stride}: max abs err "
                f"{float(jnp.max(jnp.abs(out - ref)))}")

    print("KERNEL_OK")
</pallas_src>

<mosaic_0001>
module attributes {stable_mosaic.version = 11 : i64} {
  func.func @kernel(%arg0: i32, %arg1: i32, %arg2: memref<1x1x180x36xbf16, #tpu.memory_space<vmem>>, %arg3: memref<1x180x1xf32, #tpu.memory_space<vmem>>, %arg4: memref<36x8xbf16, #tpu.memory_space<vmem>>, %arg5: memref<72x8xbf16, #tpu.memory_space<vmem>>, %arg6: memref<3x8xf32, #tpu.memory_space<vmem>>, %arg7: memref<3x8xf32, #tpu.memory_space<vmem>>, %arg8: memref<1x1x128x4xf32, #tpu.memory_space<vmem>>, %arg9: memref<1x1x128x8xf32, #tpu.memory_space<vmem>>, %arg10: memref<10x18x8xbf16, #tpu.memory_space<vmem>>) attributes {dimension_semantics = [#tpu.dimension_semantics<parallel>, #tpu.dimension_semantics<parallel>], iteration_bounds = array<i64: 2, 2>, scalar_prefetch = 0 : i64, scratch_operands = 1 : i64, tpu.core_type = #tpu.core_type<tc>, window_params = [{transform_indices = @transform_0, window_bounds = array<i64: 1, 1, 180, 36>}, {transform_indices = @transform_1, window_bounds = array<i64: 1, 180, 1>}, {pipeline_mode = #tpu.pipeline_mode<synchronous>, transform_indices = @transform_2, window_bounds = array<i64: 36, 8>}, {pipeline_mode = #tpu.pipeline_mode<synchronous>, transform_indices = @transform_3, window_bounds = array<i64: 72, 8>}, {pipeline_mode = #tpu.pipeline_mode<synchronous>, transform_indices = @transform_4, window_bounds = array<i64: 3, 8>}, {pipeline_mode = #tpu.pipeline_mode<synchronous>, transform_indices = @transform_5, window_bounds = array<i64: 3, 8>}, {transform_indices = @transform_6, window_bounds = array<i64: 1, 1, 128, 4>}, {transform_indices = @transform_7, window_bounds = array<i64: 1, 1, 128, 8>}]} {
    %c0 = arith.constant 0 : index
    %c0_0 = arith.constant 0 : index
    %c0_1 = arith.constant 0 : index
    %c0_2 = arith.constant 0 : index
    %0 = vector.load %arg2[%c0, %c0_0, %c0_1, %c0_2] : memref<1x1x180x36xbf16, #tpu.memory_space<vmem>>, vector<1x1x180x36xbf16>
    %1 = vector.shape_cast %0 : vector<1x1x180x36xbf16> to vector<180x36xbf16>
    %c0_3 = arith.constant 0 : index
    %c0_4 = arith.constant 0 : index
    %2 = vector.load %arg4[%c0_3, %c0_4] : memref<36x8xbf16, #tpu.memory_space<vmem>>, vector<36x8xbf16>
    %cst = arith.constant dense<0.000000e+00> : vector<180x8xf32>
    %3 = tpu.matmul %1, %2, %cst {dimension_numbers = #tpu.dot_dimension_numbers<[1], [0], [0], [1], [0, 0, 1, 1], [], []>} : vector<180x36xbf16>, vector<36x8xbf16>, vector<180x8xf32> -> vector<180x8xf32>
    %c0_5 = arith.constant 0 : index
    %c0_6 = arith.constant 0 : index
    %4 = vector.load %arg6[%c0_5, %c0_6] : memref<3x8xf32, #tpu.memory_space<vmem>>, vector<1x8xf32>
    %c1 = arith.constant 1 : index
    %c0_7 = arith.constant 0 : index
    %5 = vector.load %arg6[%c1, %c0_7] : memref<3x8xf32, #tpu.memory_space<vmem>>, vector<1x8xf32>
    %c2 = arith.constant 2 : index
    %c0_8 = arith.constant 0 : index
    %6 = vector.load %arg6[%c2, %c0_8] : memref<3x8xf32, #tpu.memory_space<vmem>>, vector<1x8xf32>
    %7 = vector.broadcast %6 : vector<1x8xf32> to vector<180x8xf32>
    %8 = arith.mulf %7, %3 : vector<180x8xf32>
    %9 = vector.broadcast %5 : vector<1x8xf32> to vector<180x8xf32>
    %10 = arith.addf %9, %8 : vector<180x8xf32>
    %11 = arith.mulf %3, %10 : vector<180x8xf32>
    %12 = vector.broadcast %4 : vector<1x8xf32> to vector<180x8xf32>
    %13 = arith.addf %12, %11 : vector<180x8xf32>
    %c0_9 = arith.constant 0 : index
    %c0_10 = arith.constant 0 : index
    %c0_11 = arith.constant 0 : index
    %14 = vector.load %arg3[%c0_9, %c0_10, %c0_11] : memref<1x180x1xf32, #tpu.memory_space<vmem>>, vector<1x180x1xf32>
    %15 = vector.shape_cast %14 : vector<1x180x1xf32> to vector<180x1xf32>
    %16 = vector.broadcast %15 : vector<180x1xf32> to vector<180x8xf32>
    %17 = arith.mulf %13, %16 : vector<180x8xf32>
    %18 = vector.shape_cast %17 : vector<180x8xf32> to vector<10x18x8xf32>
    %19 = arith.truncf %18 : vector<10x18x8xf32> to vector<10x18x8xbf16>
    %c0_12 = arith.constant 0 : index
    %c0_13 = arith.constant 0 : index
    %c0_14 = arith.constant 0 : index
    %20 = vector.load %arg10[%c0_12, %c0_13, %c0_14] : memref<10x18x8xbf16, #tpu.memory_space<vmem>>, vector<10x18x8xbf16>
    tpu.vector_store %arg10[%c0_12, %c0_13, %c0_14], %19 {strides = array<i32>} : memref<10x18x8xbf16, #tpu.memory_space<vmem>>, vector<10x18x8xbf16>,
    %c0_15 = arith.constant 0 : index
    %c0_16 = arith.constant 0 : index
    %c0_17 = arith.constant 0 : index
    %21 = vector.load %arg10[%c0_15, %c0_16, %c0_17] : memref<10x18x8xbf16, #tpu.memory_space<vmem>>, vector<8x16x8xbf16>
    %22 = vector.shape_cast %21 : vector<8x16x8xbf16> to vector<128x8xbf16>
    %c0_18 = arith.constant 0 : index
    %c1_19 = arith.constant 1 : index
    %c0_20 = arith.constant 0 : index
    %23 = vector.load %arg10[%c0_18, %c1_19, %c0_20] : memref<10x18x8xbf16, #tpu.memory_space<vmem>>, vector<8x16x8xbf16>
    %24 = vector.shape_cast %23 : vector<8x16x8xbf16> to vector<128x8xbf16>
    %c0_21 = arith.constant 0 : index
    %c2_22 = arith.constant 2 : index
    %c0_23 = arith.constant 0 : index
    %25 = vector.load %arg10[%c0_21, %c2_22, %c0_23] : memref<10x18x8xbf16, #tpu.memory_space<vmem>>, vector<8x16x8xbf16>
    %26 = vector.shape_cast %25 : vector<8x16x8xbf16> to vector<128x8xbf16>
    %c1_24 = arith.constant 1 : index
    %c0_25 = arith.constant 0 : index
    %c0_26 = arith.constant 0 : index
    %27 = vector.load %arg10[%c1_24, %c0_25, %c0_26] : memref<10x18x8xbf16, #tpu.memory_space<vmem>>, vector<8x16x8xbf16>
    %28 = vector.shape_cast %27 : vector<8x16x8xbf16> to vector<128x8xbf16>
    %c1_27 = arith.constant 1 : index
    %c1_28 = arith.constant 1 : index
    %c0_29 = arith.constant 0 : index
    %29 = vector.load %arg10[%c1_27, %c1_28, %c0_29] : memref<10x18x8xbf16, #tpu.memory_space<vmem>>, vector<8x16x8xbf16>
    %30 = vector.shape_cast %29 : vector<8x16x8xbf16> to vector<128x8xbf16>
    %c1_30 = arith.constant 1 : index
    %c2_31 = arith.constant 2 : index
    %c0_32 = arith.constant 0 : index
    %31 = vector.load %arg10[%c1_30, %c2_31, %c0_32] : memref<10x18x8xbf16, #tpu.memory_space<vmem>>, vector<8x16x8xbf16>
    %32 = vector.shape_cast %31 : vector<8x16x8xbf16> to vector<128x8xbf16>
    %c2_33 = arith.constant 2 : index
    %c0_34 = arith.constant 0 : index
    %c0_35 = arith.constant 0 : index
    %33 = vector.load %arg10[%c2_33, %c0_34, %c0_35] : memref<10x18x8xbf16, #tpu.memory_space<vmem>>, vector<8x16x8xbf16>
    %34 = vector.shape_cast %33 : vector<8x16x8xbf16> to vector<128x8xbf16>
    %c2_36 = arith.constant 2 : index
    %c1_37 = arith.constant 1 : index
    %c0_38 = arith.constant 0 : index
    %35 = vector.load %arg10[%c2_36, %c1_37, %c0_38] : memref<10x18x8xbf16, #tpu.memory_space<vmem>>, vector<8x16x8xbf16>
    %36 = vector.shape_cast %35 : vector<8x16x8xbf16> to vector<128x8xbf16>
    %c2_39 = arith.constant 2 : index
    %c2_40 = arith.constant 2 : index
    %c0_41 = arith.constant 0 : index
    %37 = vector.load %arg10[%c2_39, %c2_40, %c0_41] : memref<10x18x8xbf16, #tpu.memory_space<vmem>>, vector<8x16x8xbf16>
    %38 = vector.shape_cast %37 : vector<8x16x8xbf16> to vector<128x8xbf16>
    %39 = tpu.concatenate %22, %24, %26, %28, %30, %32, %34, %36, %38 in 1 : vector<128x8xbf16>, vector<128x8xbf16>, vector<128x8xbf16>, vector<128x8xbf16>, vector<128x8xbf16>, vector<128x8xbf16>, vector<128x8xbf16>, vector<128x8xbf16>, vector<128x8xbf16> -> vector<128x72xbf16>
    %c0_42 = arith.constant 0 : index
    %c0_43 = arith.constant 0 : index
    %40 = vector.load %arg5[%c0_42, %c0_43] : memref<72x8xbf16, #tpu.memory_space<vmem>>, vector<72x8xbf16>
    %cst_44 = arith.constant dense<0.000000e+00> : vector<128x8xf32>
    %41 = tpu.matmul %39, %40, %cst_44 {dimension_numbers = #tpu.dot_dimension_numbers<[1], [0], [0], [1], [0, 0, 1, 1], [], []>} : vector<128x72xbf16>, vector<72x8xbf16>, vector<128x8xf32> -> vector<128x8xf32>
    %c0_45 = arith.constant 0 : index
    %c0_46 = arith.constant 0 : index
    %c0_47 = arith.constant 0 : index
    %c0_48 = arith.constant 0 : index
    %42 = vector.load %arg8[%c0_45, %c0_46, %c0_47, %c0_48] : memref<1x1x128x4xf32, #tpu.memory_space<vmem>>, vector<1x1x128x4xf32>
    %43 = vector.shape_cast %42 : vector<1x1x128x4xf32> to vector<128x4xf32>
    %cst_49 = arith.constant 0.000000e+00 : f32
    %44 = vector.broadcast %cst_49 : f32 to vector<128x4xf32>
    %45 = tpu.concatenate %43, %44 in 1 : vector<128x4xf32>, vector<128x4xf32> -> vector<128x8xf32>
    %46 = arith.addf %41, %45 : vector<128x8xf32>
    %c0_50 = arith.constant 0 : index
    %c0_51 = arith.constant 0 : index
    %47 = vector.load %arg7[%c0_50, %c0_51] : memref<3x8xf32, #tpu.memory_space<vmem>>, vector<1x8xf32>
    %c1_52 = arith.constant 1 : index
    %c0_53 = arith.constant 0 : index
    %48 = vector.load %arg7[%c1_52, %c0_53] : memref<3x8xf32, #tpu.memory_space<vmem>>, vector<1x8xf32>
    %c2_54 = arith.constant 2 : index
    %c0_55 = arith.constant 0 : index
    %49 = vector.load %arg7[%c2_54, %c0_55] : memref<3x8xf32, #tpu.memory_space<vmem>>, vector<1x8xf32>
    %50 = vector.broadcast %49 : vector<1x8xf32> to vector<128x8xf32>
    %51 = arith.mulf %50, %46 : vector<128x8xf32>
    %52 = vector.broadcast %48 : vector<1x8xf32> to vector<128x8xf32>
    %53 = arith.addf %52, %51 : vector<128x8xf32>
    %54 = arith.mulf %46, %53 : vector<128x8xf32>
    %55 = vector.broadcast %47 : vector<1x8xf32> to vector<128x8xf32>
    %56 = arith.addf %55, %54 : vector<128x8xf32>
    %c0_56 = arith.constant 0 : index
    %c0_57 = arith.constant 0 : index
    %c0_58 = arith.constant 0 : index
    %c0_59 = arith.constant 0 : index
    %57 = vector.load %arg9[%c0_56, %c0_57, %c0_58, %c0_59] : memref<1x1x128x8xf32, #tpu.memory_space<vmem>>, vector<1x1x128x8xf32>
    %58 = vector.shape_cast %57 : vector<1x1x128x8xf32> to vector<128x8xf32>
    %59 = vector.shape_cast %56 : vector<128x8xf32> to vector<1x1x128x8xf32>
    tpu.vector_store %arg9[%c0_56, %c0_57, %c0_58, %c0_59], %59 {strides = array<i32>} : memref<1x1x128x8xf32, #tpu.memory_space<vmem>>, vector<1x1x128x8xf32>,
    return
  }
  func.func @transform_0(%arg0: i32, %arg1: i32) -> (i32, i32, i32, i32) {
    %c0_i32 = arith.constant 0 : i32
    %c0_i32_0 = arith.constant 0 : i32
    %c0_i32_1 = arith.constant 0 : i32
    return %arg0, %arg1, %c0_i32, %c0_i32_0 : i32, i32, i32, i32
  }
  func.func @transform_1(%arg0: i32, %arg1: i32) -> (i32, i32, i32) {
    %c0_i32 = arith.constant 0 : i32
    %c0_i32_0 = arith.constant 0 : i32
    %c0_i32_1 = arith.constant 0 : i32
    return %arg1, %c0_i32, %c0_i32_0 : i32, i32, i32
  }
  func.func @transform_2(%arg0: i32, %arg1: i32) -> (i32, i32) {
    %c0_i32 = arith.constant 0 : i32
    %c0_i32_0 = arith.constant 0 : i32
    %c0_i32_1 = arith.constant 0 : i32
    return %c0_i32, %c0_i32_0 : i32, i32
  }
  func.func @transform_3(%arg0: i32, %arg1: i32) -> (i32, i32) {
    %c0_i32 = arith.constant 0 : i32
    %c0_i32_0 = arith.constant 0 : i32
    %c0_i32_1 = arith.constant 0 : i32
    return %c0_i32, %c0_i32_0 : i32, i32
  }
  func.func @transform_4(%arg0: i32, %arg1: i32) -> (i32, i32) {
    %c0_i32 = arith.constant 0 : i32
    %c0_i32_0 = arith.constant 0 : i32
    %c0_i32_1 = arith.constant 0 : i32
    return %c0_i32, %c0_i32_0 : i32, i32
  }
  func.func @transform_5(%arg0: i32, %arg1: i32) -> (i32, i32) {
    %c0_i32 = arith.constant 0 : i32
    %c0_i32_0 = arith.constant 0 : i32
    %c0_i32_1 = arith.constant 0 : i32
    return %c0_i32, %c0_i32_0 : i32, i32
  }
  func.func @transform_6(%arg0: i32, %arg1: i32) -> (i32, i32, i32, i32) {
    %c0_i32 = arith.constant 0 : i32
    %c0_i32_0 = arith.constant 0 : i32
    %c0_i32_1 = arith.constant 0 : i32
    return %arg0, %arg1, %c0_i32, %c0_i32_0 : i32, i32, i32, i32
  }
  func.func @transform_7(%arg0: i32, %arg1: i32) -> (i32, i32, i32, i32) {
    %c0_i32 = arith.constant 0 : i32
    %c0_i32_0 = arith.constant 0 : i32
    %c0_i32_1 = arith.constant 0 : i32
    return %arg0, %arg1, %c0_i32, %c0_i32_0 : i32, i32, i32, i32
  }
}

</mosaic_0001>

<bundles_post_ra>
// kernel: tpu_custom_call.1
= control target key start
LH: loop header
LB: loop body
LE: loop exit
PB: predicated region body
PF: predicated region fallthrough
CT: control target
= control target key end

     0   :  { %s3358_s24 = smov 0   ;;  %s3360_s25 = smov 0   ;;  %s4552_s0 = inlined_call_operand.vmem [shape: bf16[2,2,180,36], index: 0, kind: input, shape index: {}]   ;;  %s4553_s1 = inlined_call_operand.vmem [shape: f32[2,180,1], index: 1, kind: input, shape index: {}]   ;;  %s4554_s2 = inlined_call_operand.vmem [shape: bf16[36,8], index: 2, kind: input, shape index: {}]   ;;  %s4555_s3 = inlined_call_operand.vmem [shape: bf16[72,8], index: 3, kind: input, shape index: {}]   ;;  %s4556_s4 = inlined_call_operand.vmem [shape: f32[3,8], index: 4, kind: input, shape index: {}]   ;;  %s4557_s5 = inlined_call_operand.vmem [shape: f32[3,8], index: 5, kind: input, shape index: {}]   ;;  %s4558_s6 = inlined_call_operand.vmem [shape: f32[2,2,128,4], index: 6, kind: input, shape index: {}]   ;;  %s4559_s7 = inlined_call_operand.vmem [shape: f32[2,2,128,8], index: 7, kind: output, shape index: {}]  }
   0x1   :  { %s3362_s26 = smov 0   ;;  %s3364_s27 = smov 0  }
   0x2   :  { %s3366_s28 = smov 0  }
   0x3 LB: > { %s26_s29 = sadd.s32 1, %s3299_s26  ;;  %s29_s30 = sadd.s32 1, %s3303_s27  ;;  %s3307_s28 = sphi %s3366_s28, %s17_s28   ;;  %s3303_s27 = sphi %s3364_s27, %s4576_s27   ;;  %s3299_s26 = sphi %s3362_s26, %s4575_s26   ;;  %s3295_s25 = sphi %s3360_s25, %s4574_s25   ;;  %s3291_s24 = sphi %s3358_s24, %s4573_s24  }
   0x4   : > { %p27_p0 = scmp.ge.s32.totalorder %s26_s29, 2  ;;  %p2937_p1 = scmp.ge.s32.totalorder %s3307_s28, 1 }
   0x5   : > { %p283_p2 = scmp.lt.s32.totalorder %s3307_s28, 5 }
   0x6   : > { %s4578_s29 = smov (%p27_p0, %s26_s29), 0  ;;  %s4580_s30 = smov (!%p27_p0, %s29_s30), %s3303_s27 }
   0x7   : > { %p284_p3 = pnand %p2937_p1, %p283_p2  ;;  %p31_p4 = scmp.ge.s32.totalorder %s4580_s30, 2 }
   0x8   : > { %p339_p5 = scmp.lt.s32.totalorder (!%p284_p3), %s3291_s24, 1  ;;  %p337_p6 = scmp.lt.s32.totalorder (!%p284_p3), %s3295_s25, 1 }
   0x9   : > { %s4582_s30 = smov (%p31_p4, %s4580_s30), 0  ;;  %287 = sbr.rel (%p284_p3) target bundleno = 685 (0x2ad), region = 48 }
   0xa   : > { %s3310_s15 = smov (!%p284_p3), 16   ;;  %s3311_s16 = smov (!%p284_p3), 8  }
   0xb   : > { %s3315_s20 = smov (!%p284_p3), 48   ;;  %s3316_s21 = smov (!%p284_p3), 64  }
   0xc   : > { %s3317_s22 = smov (!%p284_p3), 56  }
   0xe   : > { %v397_v0 = vld [vmem:[%s4554_s2 + $0x10] sm:$0x3]  ;;  %v3309_v2 = vmov 0   ;;  %vm508_vm0 = vcmask 1041408   ;;  %s4584_s24 = smov (!%p339_p5, %s3291_s24), 1  ;;  %s4586_s25 = smov (!%p337_p6, %s3295_s25), 1 }
   0xf   : > { %v465_v1 = vunpack.c.l.b16 %v397_v0  ;;  %3261 = vset.pattern.permute.xlu1 %v3309_v2  ;;  %3260 = vset.pattern.permute.xlu0 %v3309_v2  ;;  %s3210_s10 = smul.u32 184, %s4584_s24  ;;  %v3168_v5 = vld [vmem:[%s4554_s2 + $0x8] sm:$0xff]  ;;  %v3167_v8 = vld [vmem:[%s4554_s2] sm:$0xff]  ;;  %vm471_vm1 = vcmask 293888   ;;  %vm1116_vm2 = vcmask 60416   ;;  %vm1119_vm3 = vcmask 57344  }
  0x10   : > { %3262 = vset.pattern.permute.xlu2 %v3309_v2  ;;  %s3208_s11 = smul.u32 23, %s4584_s24  ;;  %v3468_v47 = vld [vmem:[%s4556_s4 + $0x2] ss:$0 sm:$0xff]  ;;  %v3473_v48 = vld [vmem:[%s4556_s4 + $0x1] ss:$0 sm:$0xff]  ;;  %vm1399_vm4 = vcmask 1042432  }
  0x11   : > { %v468_v3 = vpack.c.b16 %v465_v1, %v465_v1  ;;  %s3400_s14 = scalar_lea.vmem %s4553_s1, %s3210_s10  ;;  %s3209_s17 = smul.u32 46, %s4586_s25  ;;  %v3480_v53 = vld [vmem:[%s4556_s4] ss:$0 sm:$0xff]  ;;  %vm1400_vm5 = vcmask 1046532   ;;  %vm1172_vm6 = vsmask.f32 3328 }
  0x12   : > { %v680_v6 = vld [vmem:[%s3400_s14 + $0x10] sm:$0xff]  ;;  %v678_v7 = vld [vmem:[%s3400_s14] sm:$0xff]  ;;  %v681_v10 = vld [vmem:[%s3400_s14 + $0x18] sm:$0xff]  ;;  %vm1173_vm7 = vsmask.f32 7440  ;;  %vm2436_vm10 = vcmask 64512  }
  0x13   : > { %v510_v4 = vsel %vm508_vm0, %v468_v3, 0  ;;  %713 = vperm.xlu1 %3261, %v680_v6   ;;  %703 = vperm.xlu0 %3260, %v678_v7   ;;  %s343_s18 = sadd.s32 %s3209_s17, %s3208_s11  ;;  %v682_v9 = vld [vmem:[%s3400_s14 + $0x20] sm:$0xff]  ;;  %v679_v12 = vld [vmem:[%s3400_s14 + $0x8] sm:$0xff]  ;;  %v685_v18 = vld [vmem:[%s3400_s14 + $0x38] sm:$0xff]  ;;  %s3312_s17 = smov 24   ;;  %vm2461_vm11 = vcmask 130048  }
  0x14   : > { %517 = vmatpush.bf16.msra.mxu0 %v510_v4  ;;  %3197 = vmatpush.bf16.msra.mxu2 %v510_v4  ;;  %s2938_s19 = sshll.u32 %s343_s18, 2  ;;  %v683_v17 = vld [vmem:[%s3400_s14 + $0x28] sm:$0xff]  ;;  %v684_v19 = vld [vmem:[%s3400_s14 + $0x30] sm:$0xff]  ;;  %v686_v20 = vld [vmem:[%s3400_s14 + $0x40] sm:$0xff]  ;;  %s3313_s18 = smov 40   ;;  %vm2478_vm12 = vcmask 195584  }
  0x15   : > { %3198 = vmatpush.bf16.msra.mxu3 %v510_v4  ;;  %s3414_s8 = scalar_lea.vmem %s4552_s0, %s2938_s19  ;;  %723 = vperm.xlu2 %3262, %v682_v9   ;;  %v688_v21 = vld [vmem:[%s3400_s14 + $0x50] sm:$0xff]  ;;  %v687_v22 = vld [vmem:[%s3400_s14 + $0x48] sm:$0xff]  ;;  %v689_v25 = vld [vmem:[%s3400_s14 + $0x58] sm:$0xff]  ;;  %s3314_s19 = smov 32   ;;  %vm2495_vm13 = vcmask 261120   ;;  %vm2512_vm14 = vcmask 326656  }
  0x16   : > { %v392_v11 = vld [vmem:[%s3414_s8 + $0x58] sm:$0x3]  ;;  %v3156_v13 = vld [vmem:[%s3414_s8] sm:$0xff]  ;;  %v3161_v14 = vld [vmem:[%s3414_s8 + $0x28] sm:$0xff]  ;;  %vm2666_vm15 = vcmask 1043456   ;;  %vm2529_vm0 = vcmask 392192  }
  0x17   : > { %v443_v15 = vunpack.c.l.b16 %v392_v11  ;;  %v3157_v23 = vld [vmem:[%s3414_s8 + $0x8] sm:$0xff]  ;;  %v3162_v24 = vld [vmem:[%s3414_s8 + $0x30] sm:$0xff]  ;;  %v690_v27 = vld [vmem:[%s3400_s14 + $0x60] sm:$0xff] }
  0x18   : > { %518 = vmatpush.bf16.msra.mxu0 %v3168_v5  ;;  %3199 = vmatpush.bf16.msra.mxu2 %v3168_v5  ;;  %v691_v26 = vld [vmem:[%s3400_s14 + $0x68] sm:$0xff]  ;;  %v692_v28 = vld [vmem:[%s3400_s14 + $0x70] sm:$0xff]  ;;  %v694_v29 = vld [vmem:[%s3400_s14 + $0x80] sm:$0xff] }
  0x19   : > { %3200 = vmatpush.bf16.msra.mxu3 %v3168_v5  ;;  %v455_v16 = vpack.c.b16 %v443_v15, %v443_v15  ;;  %v693_v30 = vld [vmem:[%s3400_s14 + $0x78] sm:$0xff]  ;;  %v3158_v31 = vld [vmem:[%s3414_s8 + $0x10] sm:$0xff]  ;;  %v695_v33 = vld [vmem:[%s3400_s14 + $0x88] sm:$0xff] }
  0x1a   : > { %v3163_v32 = vld [vmem:[%s3414_s8 + $0x38] sm:$0xff]  ;;  %v696_v35 = vld [vmem:[%s3400_s14 + $0x90] sm:$0xff]  ;;  %v698_v36 = vld [vmem:[%s3400_s14 + $0xa0] sm:$0xff] }
  0x1b   : > { %718 = vperm.xlu1 %3261, %v681_v10   ;;  %708 = vperm.xlu0 %3260, %v679_v12   ;;  %v697_v34 = vld [vmem:[%s3400_s14 + $0x98] sm:$0xff]  ;;  %v700_v37 = vld [vmem:[%s3400_s14 + $0xb0] sm:$0xf]  ;;  %v699_v38 = vld [vmem:[%s3400_s14 + $0xa8] sm:$0xff] }
  0x1c   : > { %519 = vmatpush.bf16.msra.mxu0 %v3167_v8  ;;  %3201 = vmatpush.bf16.msra.mxu2 %v3167_v8  ;;  %v3159_v39 = vld [vmem:[%s3414_s8 + $0x18] sm:$0xff]  ;;  %v3164_v40 = vld [vmem:[%s3414_s8 + $0x40] sm:$0xff]  ;;  %v3165_v42 = vld [vmem:[%s3414_s8 + $0x48] sm:$0xff] }
  0x1d   : > { %3202 = vmatpush.bf16.msra.mxu3 %v3167_v8  ;;  %728 = vperm.xlu2 %3262, %v683_v17   ;;  %v3160_v41 = vld [vmem:[%s3414_s8 + $0x20] sm:$0xff]  ;;  %v3166_v43 = vld [vmem:[%s3414_s8 + $0x50] sm:$0xff]  ;;  %vm3565_vm8 = vmor %vm1399_vm4, %vm1400_vm5  ;;  %vm2563_vm4 = vcmask 523264   ;;  %vm2649_vm5 = vcmask 588800  }
  0x1e   : > { %vm3576_vm9 = vmor %vm1172_vm6, %vm1173_vm7 }
  0x1f   : > { %2998 = vmatmul.msk.bf16.vlgmr.msra.gmra.mxu0 %vm471_vm1, %v3156_v13  ;;  %3003 = vmatmul.msk.bf16.vlgmr.msra.gmra.mxu2 %vm471_vm1, %v3161_v14 }
  0x20   : > { %3009 = vmatmul.msk.bf16.vlgmr.msra.gmra.mxu3 %vm471_vm1, %v455_v16 }
  0x23   : > { %738 = vperm.xlu1 %3261, %v685_v18   ;;  %733 = vperm.xlu0 %3260, %v684_v19  }
  0x25   : > { %743 = vperm.xlu2 %3262, %v686_v20  }
  0x2b   : > { %753 = vperm.xlu1 %3261, %v688_v21   ;;  %748 = vperm.xlu0 %3260, %v687_v22  }
  0x2d   : > { %758 = vperm.xlu2 %3262, %v689_v25  }
  0x2f   : > { %2999 = vmatmul.msk.bf16.gmra.mxu0 %vm471_vm1, %v3157_v23  ;;  %3004 = vmatmul.msk.bf16.gmra.mxu2 %vm471_vm1, %v3162_v24 }
  0x33   : > { %768 = vperm.xlu1 %3261, %v691_v26   ;;  %763 = vperm.xlu0 %3260, %v690_v27  }
  0x35   : > { %773 = vperm.xlu2 %3262, %v692_v28  }
  0x3b   : > { %783 = vperm.xlu1 %3261, %v694_v29   ;;  %778 = vperm.xlu0 %3260, %v693_v30  }
  0x3d   : > { %788 = vperm.xlu2 %3262, %v695_v33  }
  0x3f   : > { %3000 = vmatmul.msk.bf16.gmra.mxu0 %vm471_vm1, %v3158_v31  ;;  %3005 = vmatmul.msk.bf16.gmra.mxu2 %vm471_vm1, %v3163_v32 }
  0x43   : > { %798 = vperm.xlu1 %3261, %v697_v34   ;;  %793 = vperm.xlu0 %3260, %v696_v35  }
  0x45   : > { %803 = vperm.xlu2 %3262, %v698_v36  }
  0x4b   : > { %813 = vperm.xlu1 %3261, %v700_v37   ;;  %808 = vperm.xlu0 %3260, %v699_v38  }
  0x4f   : > { %3001 = vmatmul.msk.bf16.gmra.mxu0 %vm471_vm1, %v3159_v39  ;;  %3006 = vmatmul.msk.bf16.gmra.mxu2 %vm471_vm1, %v3164_v40 }
  0x5f   : > { %3002 = vmatmul.msk.bf16.gmra.mxu0 %vm471_vm1, %v3160_v41  ;;  %3007 = vmatmul.msk.bf16.gmra.mxu2 %vm471_vm1, %v3165_v42 }
  0x6f   : > { %3008 = vmatmul.msk.bf16.gmra.mxu2 %vm471_vm1, %v3166_v43  ;;  %v3487_v59 = vpop.permute.xlu2 %723  ;;  %vm2546_vm1 = vcmask 457728  }
  0x77   : > { %v3494_v10 = vpop.permute.xlu2 %728 }
  0x7f   : > { %v3510_v33 = vpop.permute.xlu2 %743 }
  0x85   : > { %v714_v44 = vpop.permute.xlu1 %713  ;;  %v704_v49 = vpop.permute.xlu0 %703 }
  0x8d   : > { %v3461_v45 = vpop.permute.xlu1 %718  ;;  %v709_v63 = vpop.permute.xlu0 %708 }
  0x95   : > { %v3463_v46 = vpop.permute.xlu1 %738  ;;  %v3498_v14 = vpop.permute.xlu0 %733 }
  0x9c   : > { %v521_v50 = vpop.f32.mrf.mxu0 }
  0x9d   : > { %v584_v51 = vmul.f32 %v3468_v47, %v521_v50  ;;  %v3482_v55 = vpop.permute.xlu1 %753  ;;  %v3514_v38 = vpop.permute.xlu0 %748 }
  0x9f   : > { %v608_v52 = vadd.f32 %v3473_v48, %v584_v51 }
  0xa1   : > { %v631_v54 = vmul.f32 %v608_v52, %v521_v50 }
  0xa2   : > { %v546_v56 = vpop.f32.mrf.mxu2 }
  0xa3   : > { %v655_v57 = vadd.f32 %v3480_v53, %v631_v54  ;;  %v3485_v58 = vpop.f32.mrf.mxu3  ;;  %v594_v13 = vmul.f32 %v3468_v47, %v546_v56 }
  0xa4   : > { %v523_v60 = vpop.f32.mrf.mxu0  ;;  %v606_v41 = vmul.f32 %v3468_v47, %v3485_v58 }
  0xa5   : > { %v816_v61 = vmul.f32 %v704_v49, %v655_v57  ;;  %v585_v62 = vmul.f32 %v3468_v47, %v523_v60  ;;  %v3491_v6 = vpop.permute.xlu1 %768  ;;  %v618_v22 = vadd.f32 %v3473_v48, %v594_v13 }
  0xa7   : > { %v862_v0 = vrot.slane %v816_v61, 2  ;;  %v863_v1 = vrot.slane %v816_v61, 4  ;;  %v864_v2 = vrot.slane %v816_v61, 6  ;;  %929 = vst [vmem:[#allocation1] ss:$4 sm:$0xff] %v816_v61  ;;  %v609_v3 = vadd.f32 %v3473_v48, %v585_v62 }
  0xa8   : > { %v641_v31 = vmul.f32 %v618_v22, %v546_v56 }
  0xa9   : > { %931 = vst [vmem:[#allocation1 + $0x1] ss:$4 sm:$0xff] %v862_v0  ;;  %v632_v4 = vmul.f32 %v609_v3, %v523_v60  ;;  %v630_v60 = vadd.f32 %v3473_v48, %v606_v41 }
  0xaa   : > { %933 = vst [vmem:[#allocation1 + $0x2] ss:$4 sm:$0xff] %v863_v1  ;;  %v548_v5 = vpop.f32.mrf.mxu2  ;;  %v665_v43 = vadd.f32 %v3480_v53, %v641_v31 }
  0xab   : > { %935 = vst [vmem:[#allocation1 + $0x3] ss:$4 sm:$0xff] %v864_v2  ;;  %v578_v7 = vpop.f32.mrf.mxu3  ;;  %v656_v8 = vadd.f32 %v3480_v53, %v632_v4  ;;  %v595_v23 = vmul.f32 %v3468_v47, %v548_v5  ;;  %v653_v13 = vmul.f32 %v630_v60, %v3485_v58 }
  0xac   : > { %v526_v9 = vpop.f32.mrf.mxu0 }
  0xad   : > { %v817_v11 = vmul.f32 %v709_v63, %v656_v8  ;;  %v586_v12 = vmul.f32 %v3468_v47, %v526_v9  ;;  %v3504_v27 = vpop.permute.xlu1 %783  ;;  %v619_v32 = vadd.f32 %v3473_v48, %v595_v23  ;;  %v3525_v63 = vmul.f32 %v3482_v55, %v665_v43 }
  0xaf   : > { %v865_v15 = vrot.slane %v817_v11, 2  ;;  %v866_v16 = vrot.slane %v817_v11, 4  ;;  %v867_v17 = vrot.slane %v817_v11, 6  ;;  %937 = vst [vmem:[#allocation1 + $0x20] ss:$4 sm:$0xff] %v817_v11  ;;  %v610_v18 = vadd.f32 %v3473_v48, %v586_v12  ;;  %v759_v12 = vpop.permute.xlu2 %758 }
  0xb0   : > { %v642_v49 = vmul.f32 %v619_v32, %v548_v5  ;;  %v893_v58 = vrot.slane %v3525_v63, 4 }
  0xb1   : > { %939 = vst [vmem:[#allocation1 + $0x21] ss:$4 sm:$0xff] %v865_v15  ;;  %v633_v20 = vmul.f32 %v610_v18, %v526_v9 }
  0xb2   : > { %v944_v19 = vld.sshfl [vmem:[#allocation1] sm:$0xff pattern:$0x73625140]  ;;  %v551_v21 = vpop.f32.mrf.mxu2  ;;  %941 = vst [vmem:[#allocation1 + $0x22] ss:$4 sm:$0xff] %v866_v16  ;;  %v666_v1 = vadd.f32 %v3480_v53, %v642_v49 }
  0xb3   : > { %v1086_v24 = vpack.c.bf16 %v944_v19, %v944_v19  ;;  %943 = vst [vmem:[#allocation1 + $0x23] ss:$4 sm:$0xff] %v867_v17  ;;  %v657_v25 = vadd.f32 %v3480_v53, %v633_v20  ;;  %v596_v28 = vmul.f32 %v3468_v47, %v551_v21  ;;  %v892_v19 = vrot.slane %v3525_v63, 2  ;;  %v764_v20 = vpop.permute.xlu0 %763 }
  0xb4   : > { %v528_v26 = vpop.f32.mrf.mxu0  ;;  %v3535_v17 = vmul.f32 %v759_v12, %v666_v1 }
  0xb5   : > { %1117 = vst.msk [vmem:[#allocation2] sm:$0xf] %vm1116_vm2, %v1086_v24  ;;  %v818_v29 = vmul.f32 %v714_v44, %v657_v25  ;;  %v587_v30 = vmul.f32 %v3468_v47, %v528_v26  ;;  %v620_v37 = vadd.f32 %v3473_v48, %v596_v28  ;;  %v3528_v2 = vpop.permute.xlu1 %798  ;;  %v894_v28 = vrot.slane %v3525_v63, 6 }
  0xb7   : > { %v868_v34 = vrot.slane %v818_v29, 2  ;;  %946 = vst [vmem:[#allocation1] ss:$4 sm:$0xff] %v818_v29  ;;  %v611_v35 = vadd.f32 %v3473_v48, %v587_v30  ;;  %v869_v36 = vrot.slane %v818_v29, 4  ;;  %v870_v39 = vrot.slane %v818_v29, 6 }
  0xb8   : > { %v643_v56 = vmul.f32 %v620_v37, %v551_v21 }
  0xb9   : > { %v634_v40 = vmul.f32 %v611_v35, %v528_v26 }
  0xba   : > { %v553_v42 = vpop.f32.mrf.mxu2  ;;  %v945_v44 = vld.sshfl [vmem:[#allocation1 + $0x20] sm:$0xff pattern:$0x73625140]  ;;  %v667_v8 = vadd.f32 %v3480_v53, %v643_v56 }
  0xbb   : > { %v597_v50 = vmul.f32 %v3468_v47, %v553_v42  ;;  %948 = vst [vmem:[#allocation1 + $0x20] ss:$4 sm:$0xff] %v868_v34  ;;  %v658_v51 = vadd.f32 %v3480_v53, %v634_v40  ;;  %v1087_v54 = vpack.c.bf16 %v945_v44, %v945_v44  ;;  %v895_v34 = vrot.slane %v3535_v17, 2 }
  0xbc   : > { %v531_v52 = vpop.f32.mrf.mxu0  ;;  %949 = vst [vmem:[#allocation1 + $0x21] ss:$4 sm:$0xff] %v869_v36  ;;  %v1148_v62 = vld [vmem:[#allocation2] sm:$0xf]  ;;  %v3541_v24 = vmul.f32 %v764_v20, %v667_v8  ;;  %v677_v36 = vadd.f32 %v3480_v53, %v653_v13  ;;  %v896_v40 = vrot.slane %v3535_v17, 4  ;;  %v897_v44 = vrot.slane %v3535_v17, 6 }
  0xbd   : > { %950 = vst [vmem:[#allocation1 + $0x22] ss:$4 sm:$0xff] %v870_v39  ;;  %v819_v57 = vmul.f32 %v3461_v45, %v658_v51  ;;  %v588_v61 = vmul.f32 %v3468_v47, %v531_v52  ;;  %v621_v3 = vadd.f32 %v3473_v48, %v597_v50  ;;  %v1176_v55 = vshrl.u32 %v1148_v62, 16  ;;  %v1367_v43 = vld [vmem:[#allocation2] sm:$0xe]  ;;  %v814_v50 = vpop.permute.xlu1 %813 }
  0xbe   : > { %v947_v0 = vld.sshfl [vmem:[#allocation1] sm:$0xff pattern:$0x73625140]  ;;  %1118 = vst.msk [vmem:[#allocation2 + $0x4] sm:$0xf] %vm1116_vm2, %v1087_v54  ;;  %v1179_v11 = vshll.u32 %v1148_v62, 16 }
  0xbf   : > { %v871_v4 = vrot.slane %v819_v57, 2  ;;  %v872_v5 = vrot.slane %v819_v57, 4  ;;  %v873_v45 = vrot.slane %v819_v57, 6  ;;  %951 = vst [vmem:[#allocation1 + $0x23] ss:$4 sm:$0xff] %v819_v57  ;;  %v612_v7 = vadd.f32 %v3473_v48, %v588_v61 }
  0xc0   : > { %v1088_v9 = vpack.c.bf16 %v947_v0, %v947_v0  ;;  %v644_v21 = vmul.f32 %v621_v3, %v553_v42  ;;  %v1178_v25 = vrot.slane %v1176_v55, 4  ;;  %v1181_v26 = vrot.slane %v1179_v11, 5 }
  0xc1   : > { %953 = vst [vmem:[#allocation1] ss:$4 sm:$0xff] %v871_v4  ;;  %v635_v15 = vmul.f32 %v612_v7, %v531_v52  ;;  %v898_v49 = vrot.slane %v3541_v24, 2  ;;  %v899_v62 = vrot.slane %v3541_v24, 4  ;;  %v3010_v1 = vrot.slane %v1367_v43, 9 }
  0xc2   : > { %v556_v16 = vpop.f32.mrf.mxu2  ;;  %954 = vst [vmem:[#allocation1 + $0x1] ss:$4 sm:$0xff] %v872_v5  ;;  %v668_v41 = vadd.f32 %v3480_v53, %v644_v21  ;;  %v1182_v51 = vor.u32 %v1181_v26, %v1178_v25  ;;  %v3560_v5 = vmul.f32 %v814_v50, %v677_v36 }
  0xc3   : > { %v598_v18 = vmul.f32 %v3468_v47, %v556_v16  ;;  %955 = vst [vmem:[#allocation1 + $0x2] ss:$4 sm:$0xff] %v873_v45  ;;  %v659_v22 = vadd.f32 %v3480_v53, %v635_v15 }
  0xc4   : > { %v533_v23 = vpop.f32.mrf.mxu0  ;;  %1120 = vst.msk [vmem:[#allocation2 + $0x8] sm:$0x1] %vm1119_vm3, %v1088_v9  ;;  %v3558_v4 = vmul.f32 %v3491_v6, %v668_v41  ;;  %v1183_v13 = vrot.slane %v1182_v51, 4 }
  0xc5   : > { %v820_v29 = vmul.f32 %v3487_v59, %v659_v22  ;;  %v622_v30 = vadd.f32 %v3473_v48, %v598_v18  ;;  %v589_v31 = vmul.f32 %v3468_v47, %v533_v23  ;;  %v1149_v32 = vld [vmem:[#allocation2 + $0x4] sm:$0xf] }
  0xc6   : > { %v952_v35 = vld.sshfl [vmem:[#allocation1 + $0x20] sm:$0xff pattern:$0x73625140]  ;;  %v1185_v37 = vshll.u32 %v1149_v32, 16  ;;  %v1189_v39 = vshrl.u32 %v1149_v32, 16  ;;  %v1404_v3 = vrot.slane %v1149_v32, 5 }
  0xc7   : > { %v874_v42 = vrot.slane %v820_v29, 2  ;;  %956 = vst [vmem:[#allocation1 + $0x3] ss:$4 sm:$0xff] %v820_v29  ;;  %v613_v59 = vadd.f32 %v3473_v48, %v589_v31  ;;  %v645_v54 = vmul.f32 %v622_v30, %v556_v16  ;;  %v1089_v61 = vpack.c.bf16 %v952_v35, %v952_v35 }
  0xc8   : > { %v1187_v52 = vrot.slane %v1185_v37, 5  ;;  %v1191_v60 = vrot.slane %v1189_v39, 4  ;;  %v875_v11 = vrot.slane %v820_v29, 4  ;;  %v876_v12 = vrot.slane %v820_v29, 6 }
  0xc9   : > { %957 = vst [vmem:[#allocation1 + $0x20] ss:$4 sm:$0xff] %v874_v42  ;;  %v636_v56 = vmul.f32 %v613_v59, %v533_v23  ;;  %v669_v15 = vadd.f32 %v3480_v53, %v645_v54  ;;  %v1405_v23 = vsel %vm3565_vm8, %v3010_v1, %v1404_v3  ;;  %v1406_v25 = vrot.slane %v1404_v3, 4 }
  0xca   : > { %v558_v57 = vpop.f32.mrf.mxu2  ;;  %v1192_v55 = vor.u32 %v1191_v60, %v1187_v52  ;;  %1121 = vst.msk [vmem:[#allocation2 + $0xc] sm:$0xf] %vm1116_vm2, %v1089_v61  ;;  %v1188_v39 = vsel %vm3576_vm9, %v1183_v13, %v1187_v52  ;;  %v2140_v59 = vunpack.c.l.b16 %v1405_v23  ;;  %v900_v54 = vrot.slane %v3541_v24, 6  ;;  %v774_v61 = vpop.permute.xlu2 %773 }
  0xcb   : > { %v599_v0 = vmul.f32 %v3468_v47, %v558_v57  ;;  %v660_v45 = vadd.f32 %v3480_v53, %v636_v56  ;;  %v1164_v8 = vld [vmem:[#allocation2 + $0x8] sm:$0x1]  ;;  %v2100_v1 = vunpack.c.l.b16 %v1188_v39 }
  0xcc   : > { %v536_v7 = vpop.f32.mrf.mxu0  ;;  %v1407_v20 = vrot.slane %v1164_v8, 5  ;;  %v1193_v26 = vrot.slane %v1192_v55, 4  ;;  %v1195_v29 = vshll.u32 %v1164_v8, 16  ;;  %v3593_v55 = vmul.f32 %v774_v61, %v669_v15 }
  0xcd   : > { %v623_v6 = vadd.f32 %v3473_v48, %v599_v0  ;;  %v821_v16 = vmul.f32 %v3494_v10, %v660_v45  ;;  %v590_v18 = vmul.f32 %v3468_v47, %v536_v7 }
  0xce   : > { %v958_v22 = vld.sshfl [vmem:[#allocation1] sm:$0xff pattern:$0x73625140]  ;;  %v1408_v37 = vsel %vm3565_vm8, %v1406_v25, %v1407_v20  ;;  %v1197_v41 = vrot.slane %v1195_v29, 5  ;;  %v906_v39 = vrot.slane %v3593_v55, 6 }
  0xcf   : > { %960 = vst [vmem:[#allocation1] ss:$4 sm:$0xff] %v875_v11  ;;  %v877_v30 = vrot.slane %v821_v16, 2  ;;  %v878_v31 = vrot.slane %v821_v16, 4  ;;  %v879_v10 = vrot.slane %v821_v16, 6  ;;  %v614_v32 = vadd.f32 %v3473_v48, %v590_v18 }
  0xd0   : > { %v959_v35 = vld.sshfl [vmem:[#allocation1 + $0x20] sm:$0xff pattern:$0x73625140]  ;;  %961 = vst [vmem:[#allocation1 + $0x1] ss:$4 sm:$0xff] %v876_v12  ;;  %v646_v36 = vmul.f32 %v623_v6, %v558_v57  ;;  %v2141_v43 = vunpack.c.l.b16 %v1408_v37  ;;  %v1090_v51 = vpack.c.bf16 %v958_v22, %v958_v22  ;;  %v1198_v57 = vsel %vm3576_vm9, %v1193_v26, %v1197_v41  ;;  %v779_v26 = vpop.permute.xlu0 %778 }
  0xd1   : > { %962 = vst [vmem:[#allocation1 + $0x2] ss:$4 sm:$0xff] %v821_v16  ;;  %v637_v42 = vmul.f32 %v614_v32, %v536_v7  ;;  %v1091_v60 = vpack.c.bf16 %v959_v35, %v959_v35  ;;  %v2101_v3 = vunpack.c.l.b16 %v1198_v57  ;;  %v1150_v7 = vld [vmem:[#allocation2 + $0xc] sm:$0xf]  ;;  %v901_v6 = vrot.slane %v3558_v4, 2 }
  0xd2   : > { %v561_v50 = vpop.f32.mrf.mxu2  ;;  %963 = vst [vmem:[#allocation1 + $0x3] ss:$4 sm:$0xff] %v877_v30  ;;  %v2156_v0 = vpack.c.b16 %v2141_v43, %v2140_v59  ;;  %v670_v11 = vadd.f32 %v3480_v53, %v646_v36  ;;  %v1675_v15 = vld [vmem:[#allocation2 + $0xc] sm:$0xe]  ;;  %v1200_v23 = vshrl.u32 %v1150_v7, 16  ;;  %v905_v35 = vrot.slane %v3593_v55, 4 }
  0xd3   : > { %v600_v56 = vmul.f32 %v3468_v47, %v561_v50  ;;  %964 = vst [vmem:[#allocation1 + $0x20] ss:$4 sm:$0xff] %v878_v31  ;;  %v661_v52 = vadd.f32 %v3480_v53, %v637_v42  ;;  %v2116_v16 = vpack.c.b16 %v2101_v3, %v2100_v1  ;;  %v3606_v25 = vld [vmem:[#allocation2 + $0xc] sm:$0xf]  ;;  %v1203_v31 = vshll.u32 %v1150_v7, 16 }
  0xd4   : > { %v538_v45 = vpop.f32.mrf.mxu0  ;;  %965 = vst [vmem:[#allocation1 + $0x21] ss:$4 sm:$0xff] %v879_v10  ;;  %2164 = vrot.lane.b32.xlu0 %v2156_v0, %s3310_s15  ;;  %v3616_v36 = vmul.f32 %v779_v26, %v670_v11  ;;  %v1368_v37 = vld [vmem:[#allocation2 + $0xc] sm:$0xe]  ;;  %v1202_v61 = vrot.slane %v1200_v23, 4 }
  0xd5   : > { %v624_v12 = vadd.f32 %v3473_v48, %v600_v56  ;;  %v3599_v13 = vmul.f32 %v3498_v14, %v661_v52  ;;  %v591_v18 = vmul.f32 %v3468_v47, %v538_v45  ;;  %1122 = vst.msk [vmem:[#allocation2 + $0x10] sm:$0xf] %vm1116_vm2, %v1090_v51  ;;  %2124 = vrot.lane.b32.xlu2 %v2116_v16, %s3311_s16  ;;  %v3018_v51 = vrot.slane %v1675_v15, 9 }
  0xd6   : > { %1123 = vst.msk [vmem:[#allocation2 + $0x14] sm:$0x1] %vm1119_vm3, %v1091_v60  ;;  %v1484_v56 = vshrl.u32 %v3606_v25, 16  ;;  %v1205_v52 = vrot.slane %v1203_v31, 5  ;;  %v907_v1 = vrot.slane %v3616_v36, 2  ;;  %v3011_v11 = vrot.slane %v1368_v37, 9 }
  0xd7   : > { %v647_v22 = vmul.f32 %v624_v12, %v561_v50  ;;  %v880_v14 = vrot.slane %v3599_v13, 2  ;;  %v881_v29 = vrot.slane %v3599_v13, 4  ;;  %966 = vst [vmem:[#allocation1 + $0x22] ss:$4 sm:$0xff] %v3599_v13  ;;  %v615_v30 = vadd.f32 %v3473_v48, %v591_v18 }
  0xd8   : > { %v882_v3 = vrot.slane %v3599_v13, 6 }
  0xd9   : > { %v968_v41 = vld.sshfl [vmem:[#allocation1] sm:$0xff pattern:$0x73625140]  ;;  %967 = vst [vmem:[#allocation1 + $0x23] ss:$4 sm:$0xff] %v880_v14  ;;  %v638_v42 = vmul.f32 %v615_v30, %v538_v45  ;;  %v671_v43 = vadd.f32 %v3480_v53, %v647_v22  ;;  %v3635_v14 = vrot.slane %v1484_v56, 4 }
  0xda   : > { %v563_v59 = vpop.f32.mrf.mxu2  ;;  %970 = vst [vmem:[#allocation1] ss:$4 sm:$0xff] %v881_v29  ;;  %v1092_v0 = vpack.c.bf16 %v968_v41, %v968_v41  ;;  %v1487_v29 = vshll.u32 %v3606_v25, 16  ;;  %v1206_v41 = vor.u32 %v1205_v52, %v1202_v61 }
  0xdb   : > { %v601_v50 = vmul.f32 %v3468_v47, %v563_v59  ;;  %v662_v57 = vadd.f32 %v3480_v53, %v638_v42 }
  0xdc   : > { %v541_v60 = vpop.f32.mrf.mxu0  ;;  %v3177_v45 = vld [vmem:[#allocation2 + $0xc] sm:$0xff]  ;;  %1124 = vst.msk [vmem:[#allocation2 + $0x18] sm:$0xf] %vm1116_vm2, %v1092_v0  ;;  %v1489_v20 = vrot.slane %v1487_v29, 5 }
  0xdd   : > { %v3625_v7 = vld [vmem:[#allocation2 + $0x10] sm:$0xf]  ;;  %v823_v12 = vmul.f32 %v3463_v46, %v662_v57  ;;  %v625_v16 = vadd.f32 %v3473_v48, %v601_v50  ;;  %v592_v18 = vmul.f32 %v3468_v47, %v541_v60  ;;  %v3630_v15 = vld [vmem:[#allocation2 + $0x14] sm:$0x1]  ;;  %2212 = vrot.lane.b32.xlu1 %v3177_v45, %s3312_s17  ;;  %v3639_v46 = vmul.f32 %v3504_v27, %v671_v43 }
  0xde   : > { %v1709_v22 = vrot.slane %v3625_v7, 5  ;;  %v1151_v23 = vld [vmem:[#allocation2 + $0x10] sm:$0xf]  ;;  %v1712_v13 = vrot.slane %v3630_v15, 5  ;;  %v1165_v37 = vld [vmem:[#allocation2 + $0x14] sm:$0x1] }
  0xdf   : > { %v1411_v26 = vrot.slane %v1151_v23, 5  ;;  %v883_v30 = vrot.slane %v823_v12, 2  ;;  %v616_v31 = vadd.f32 %v3473_v48, %v592_v18  ;;  %v884_v50 = vrot.slane %v823_v12, 4 }
  0xe0   : > { %v3643_v42 = vld.sshfl [vmem:[#allocation1 + $0x20] sm:$0xff pattern:$0x73625140]  ;;  %v1710_v57 = vsel %vm3565_vm8, %v3018_v51, %v1709_v22  ;;  %v1711_v56 = vrot.slane %v1709_v22, 4  ;;  %v1209_v45 = vshll.u32 %v1151_v23, 16  ;;  %v885_v25 = vrot.slane %v823_v12, 6 }
  0xe1   : > { %972 = vst [vmem:[#allocation1 + $0x20] ss:$4 sm:$0xff] %v882_v3  ;;  %v648_v8 = vmul.f32 %v625_v16, %v563_v59  ;;  %v639_v27 = vmul.f32 %v616_v31, %v541_v60  ;;  %v1413_v32 = vrot.slane %v1411_v26, 4  ;;  %v3647_v10 = vld.sshfl [vmem:[#allocation1] sm:$0xff pattern:$0x73625140]  ;;  %v1412_v0 = vsel %vm3565_vm8, %v3011_v11, %v1411_v26 }
  0xe2   : > { %v566_v43 = vpop.f32.mrf.mxu2  ;;  %973 = vst [vmem:[#allocation1 + $0x21] ss:$4 sm:$0xff] %v823_v12  ;;  %v1713_v52 = vsel %vm3565_vm8, %v1711_v56, %v1712_v13  ;;  %v1414_v51 = vrot.slane %v1165_v37, 5  ;;  %v2268_v18 = vunpack.c.l.b16 %v1710_v57  ;;  %v1213_v16 = vshrl.u32 %v1151_v23, 16 }
  0xe3   : > { %v602_v61 = vmul.f32 %v3468_v47, %v566_v43  ;;  %974 = vst [vmem:[#allocation1 + $0x22] ss:$4 sm:$0xff] %v883_v30  ;;  %v663_v3 = vadd.f32 %v3480_v53, %v639_v27  ;;  %v2269_v59 = vunpack.c.l.b16 %v1713_v52  ;;  %v1207_v12 = vrot.slane %v1206_v41, 4 }
  0xe4   : > { %v543_v60 = vpop.f32.mrf.mxu0  ;;  %975 = vst [vmem:[#allocation1 + $0x23] ss:$4 sm:$0xff] %v884_v50  ;;  %v1211_v31 = vrot.slane %v1209_v45, 5  ;;  %v1415_v11 = vsel %vm3565_vm8, %v1413_v32, %v1414_v51  ;;  %v672_v30 = vadd.f32 %v3480_v53, %v648_v8  ;;  %v2142_v57 = vunpack.c.l.b16 %v1412_v0 }
  0xe5   : > { %v626_v22 = vadd.f32 %v3473_v48, %v602_v61  ;;  %977 = vst [vmem:[#allocation1] ss:$4 sm:$0xff] %v885_v25  ;;  %v824_v13 = vmul.f32 %v3510_v33, %v663_v3  ;;  %v2284_v56 = vpack.c.b16 %v2269_v59, %v2268_v18  ;;  %v593_v26 = vmul.f32 %v3468_v47, %v543_v60 }
  0xe6   : > { %v2143_v27 = vunpack.c.l.b16 %v1415_v11  ;;  %v1215_v23 = vrot.slane %v1213_v16, 4  ;;  %v1219_v32 = vshll.u32 %v1165_v37, 16  ;;  %v908_v61 = vrot.slane %v3616_v36, 4  ;;  %v789_v37 = vpop.permute.xlu2 %788 }
  0xe7   : > { %v886_v50 = vrot.slane %v824_v13, 2  ;;  %v887_v52 = vrot.slane %v824_v13, 4  ;;  %978 = vst [vmem:[#allocation1 + $0x1] ss:$4 sm:$0xff] %v824_v13  ;;  %v649_v41 = vmul.f32 %v626_v22, %v566_v43  ;;  %2292 = vrot.lane.b32.xlu0 %v2284_v56, %s3313_s18  ;;  %v617_v33 = vadd.f32 %v3473_v48, %v593_v26 }
  0xe8   : > { %v888_v29 = vrot.slane %v824_v13, 6  ;;  %v2157_v45 = vpack.c.b16 %v2143_v27, %v2142_v57  ;;  %v1216_v25 = vor.u32 %v1215_v23, %v1211_v31  ;;  %v909_v8 = vrot.slane %v3616_v36, 6 }
  0xe9   : > { %979 = vst [vmem:[#allocation1 + $0x2] ss:$4 sm:$0xff] %v886_v50  ;;  %v640_v0 = vmul.f32 %v617_v33, %v543_v60  ;;  %v1493_v3 = vshll.u32 %v3625_v7, 16  ;;  %v1212_v43 = vsel %vm3576_vm9, %v1207_v12, %v1211_v31  ;;  %v1221_v59 = vrot.slane %v1219_v32, 5 }
  0xea   : > { %v568_v51 = vpop.f32.mrf.mxu2  ;;  %980 = vst [vmem:[#allocation1 + $0x3] ss:$4 sm:$0xff] %v887_v52  ;;  %2166 = vrot.lane.b32.xlu2 %v2157_v45, %s3310_s15  ;;  %v1217_v18 = vrot.slane %v1216_v25, 4  ;;  %v910_v22 = vrot.slane %v3639_v46, 2  ;;  %v1490_v56 = vor.u32 %v1489_v20, %v3635_v14  ;;  %v1497_v11 = vshrl.u32 %v3625_v7, 16  ;;  %v794_v25 = vpop.permute.xlu0 %793 }
  0xeb   : > { %v603_v16 = vmul.f32 %v3468_v47, %v568_v51  ;;  %v3671_v13 = vld.sshfl [vmem:[#allocation1 + $0x20] sm:$0xff pattern:$0x73625140]  ;;  %v664_v60 = vadd.f32 %v3480_v53, %v640_v0  ;;  %v3676_v26 = vmul.f32 %v789_v37, %v672_v30  ;;  %v673_v12 = vadd.f32 %v3480_v53, %v649_v41 }
  0xec   : > { %981 = vst [vmem:[#allocation1 + $0x20] ss:$4 sm:$0xff] %v888_v29  ;;  %v1222_v31 = vsel %vm3576_vm9, %v1217_v18, %v1221_v59  ;;  %v1495_v57 = vrot.slane %v1493_v3, 5  ;;  %v2102_v23 = vunpack.c.l.b16 %v1212_v43  ;;  %v911_v20 = vrot.slane %v3639_v46, 4  ;;  %v1461_v41 = vld [vmem:[#allocation2 + $0x18] sm:$0xf] }
  0xed   : > { %v3682_v27 = vmul.f32 %v3514_v38, %v664_v60  ;;  %v2103_v50 = vunpack.c.l.b16 %v1222_v31  ;;  %v627_v52 = vadd.f32 %v3473_v48, %v603_v16  ;;  %v1499_v14 = vrot.slane %v1497_v11, 4 }
  0xee   : > { %v1503_v7 = vshll.u32 %v3630_v15, 16  ;;  %v1093_v30 = vpack.c.bf16 %v3643_v42, %v3643_v42  ;;  %v912_v33 = vrot.slane %v3639_v46, 6  ;;  %v1491_v38 = vrot.slane %v1490_v56, 4 }
  0xef   : > { %v889_v29 = vrot.slane %v3682_v27, 2  ;;  %v2117_v45 = vpack.c.b16 %v2103_v50, %v2102_v23  ;;  %v913_v32 = vrot.slane %v3676_v26, 2  ;;  %v914_v0 = vrot.slane %v3676_v26, 4 }
  0xf0   : > { %v650_v3 = vmul.f32 %v627_v52, %v568_v51  ;;  %v1500_v43 = vor.u32 %v1499_v14, %v1495_v57  ;;  %1125 = vst.msk [vmem:[#allocation2 + $0x1c] sm:$0xf] %vm1116_vm2, %v1093_v30  ;;  %v915_v15 = vrot.slane %v3676_v26, 6  ;;  %v3697_v42 = vmul.f32 %v794_v25, %v673_v12  ;;  %v1676_v52 = vld [vmem:[#allocation2 + $0x18] sm:$0xe] }
  0xf1   : > { %v3695_v18 = vld.sshfl [vmem:[#allocation1] sm:$0xff pattern:$0x73625140]  ;;  %2126 = vrot.lane.b32.xlu1 %v2117_v45, %s3311_s16  ;;  %v1496_v59 = vsel %vm3576_vm9, %v1491_v38, %v1495_v57  ;;  %v1508_v37 = vshrl.u32 %v1461_v41, 16  ;;  %v1505_v51 = vrot.slane %v1503_v7, 5  ;;  %v1511_v11 = vshll.u32 %v1461_v41, 16 }
  0xf2   : > { %v571_v16 = vpop.f32.mrf.mxu2  ;;  %984 = vst [vmem:[#allocation1] ss:$4 sm:$0xff] %v3682_v27  ;;  %v1501_v60 = vrot.slane %v1500_v43, 4  ;;  %v890_v23 = vrot.slane %v3682_v27, 4  ;;  %v674_v12 = vadd.f32 %v3480_v53, %v650_v3  ;;  %v916_v30 = vrot.slane %v3697_v42, 2 }
  0xf3   : > { %v604_v56 = vmul.f32 %v3468_v47, %v571_v16  ;;  %v3704_v31 = vld.sshfl [vmem:[#allocation1 + $0x20] sm:$0xff pattern:$0x73625140]  ;;  %985 = vst [vmem:[#allocation1 + $0x1] ss:$4 sm:$0xff] %v889_v29  ;;  %v1510_v14 = vrot.slane %v1508_v37, 4  ;;  %v2228_v29 = vunpack.c.l.b16 %v1496_v59 }
  0xf4   : > { %988 = vst [vmem:[#allocation1 + $0x20] ss:$4 sm:$0xff] %v3525_v63  ;;  %v1506_v57 = vsel %vm3576_vm9, %v1501_v60, %v1505_v51  ;;  %v1513_v7 = vrot.slane %v1511_v11, 5  ;;  %v891_v41 = vrot.slane %v3682_v27, 6  ;;  %v3716_v38 = vld [vmem:[#allocation2 + $0x18] sm:$0xe]  ;;  %v1095_v11 = vpack.c.bf16 %v3671_v13, %v3671_v13 }
  0xf5   : > { %v628_v50 = vadd.f32 %v3473_v48, %v604_v56  ;;  %989 = vst [vmem:[#allocation1 + $0x21] ss:$4 sm:$0xff] %v892_v19  ;;  %v2229_v45 = vunpack.c.l.b16 %v1506_v57  ;;  %v3718_v25 = vld [vmem:[#allocation2 + $0x18] sm:$0xe]  ;;  %v917_v3 = vrot.slane %v3697_v42, 4  ;;  %v1094_v19 = vpack.c.bf16 %v3647_v10, %v3647_v10 }
  0xf6   : > { %990 = vst [vmem:[#allocation1 + $0x22] ss:$4 sm:$0xff] %v893_v58  ;;  %v1152_v60 = vld [vmem:[#allocation2 + $0x18] sm:$0xf]  ;;  %v3019_v56 = vrot.slane %v1676_v52, 9  ;;  %v1096_v58 = vpack.c.bf16 %v3695_v18, %v3695_v18  ;;  %v1514_v63 = vor.u32 %v1513_v7, %v1510_v14 }
  0xf7   : > { %v651_v37 = vmul.f32 %v628_v50, %v571_v16  ;;  %991 = vst [vmem:[#allocation1 + $0x23] ss:$4 sm:$0xff] %v894_v28  ;;  %v2244_v27 = vpack.c.b16 %v2229_v45, %v2228_v29  ;;  %v3178_v59 = vld [vmem:[#allocation2 + $0x18] sm:$0xff]  ;;  %v3733_v16 = vmul.f32 %v3528_v2, %v674_v12  ;;  %v1224_v18 = vshrl.u32 %v1152_v60, 16 }
  0xf8   : > { %v1462_v51 = vld [vmem:[#allocation2 + $0x1c] sm:$0xf]  ;;  %986 = vst [vmem:[#allocation1 + $0x2] ss:$4 sm:$0xff] %v890_v23  ;;  %2214 = vrot.lane.b32.xlu0 %v3178_v59, %s3312_s17  ;;  %v1097_v2 = vpack.c.bf16 %v3704_v31, %v3704_v31  ;;  %v804_v23 = vpop.permute.xlu2 %803  ;;  %v3026_v12 = vrot.slane %v3716_v38, 9  ;;  %v1227_v29 = vshll.u32 %v1152_v60, 16 }
  0xf9   : > { %v3185_v57 = vld [vmem:[#allocation2 + $0x18] sm:$0xff]  ;;  %v675_v10 = vadd.f32 %v3480_v53, %v651_v37  ;;  %v1517_v28 = vshll.u32 %v1462_v51, 16  ;;  %987 = vst [vmem:[#allocation1 + $0x3] ss:$4 sm:$0xff] %v891_v41  ;;  %2252 = vrot.lane.b32.xlu2 %v2244_v27, %s3314_s19  ;;  %v1716_v13 = vrot.slane %v1462_v51, 5  ;;  %v1521_v52 = vshrl.u32 %v1462_v51, 16 }
  0xfa   : > { %v3736_v50 = vld [vmem:[#allocation2 + $0x1c] sm:$0xf]  ;;  %2340 = vrot.lane.b32.xlu1 %v3185_v57, %s3315_s20  ;;  %1126 = vst.msk [vmem:[#allocation2 + $0x20] sm:$0x1] %vm1119_vm3, %v1094_v19  ;;  %v573_v7 = vpop.f32.mrf.mxu2  ;;  %v3012_v41 = vrot.slane %v3718_v25, 9  ;;  %v1515_v38 = vrot.slane %v1514_v63, 4 }
  0xfb   : > { %v1519_v14 = vrot.slane %v1517_v28, 5  ;;  %v3746_v45 = vmul.f32 %v804_v23, %v675_v10  ;;  %v2014_v37 = vrot.slane %v3736_v50, 5  ;;  %v1523_v27 = vrot.slane %v1521_v52, 4  ;;  %v1153_v59 = vld [vmem:[#allocation2 + $0x1c] sm:$0xf] }
  0xfc   : > { %1127 = vst.msk [vmem:[#allocation2 + $0x24] sm:$0xf] %vm1116_vm2, %v1095_v11  ;;  %v1717_v25 = vsel %vm3565_vm8, %v3019_v56, %v1716_v13  ;;  %v605_v57 = vmul.f32 %v3468_v47, %v573_v7  ;;  %v1226_v10 = vrot.slane %v1224_v18, 4  ;;  %v1718_v11 = vrot.slane %v1716_v13, 4 }
  0xfd   : > { %1128 = vst.msk [vmem:[#allocation2 + $0x28] sm:$0xf] %vm1116_vm2, %v1096_v58  ;;  %v1524_v60 = vor.u32 %v1523_v27, %v1519_v14  ;;  %v1229_v52 = vrot.slane %v1227_v29, 5  ;;  %v1233_v23 = vshll.u32 %v1153_v59, 16  ;;  %v2016_v19 = vrot.slane %v2014_v37, 4 }
  0xfe   : > { %1129 = vst.msk [vmem:[#allocation2 + $0x2c] sm:$0x1] %vm1119_vm3, %v1097_v2  ;;  %v993_v28 = vld.sshfl [vmem:[#allocation1 + $0x20] sm:$0xff pattern:$0x73625140]  ;;  %v1418_v58 = vrot.slane %v1153_v59, 5  ;;  %v2270_v47 = vunpack.c.l.b16 %v1717_v25  ;;  %v2015_v18 = vsel %vm3565_vm8, %v3026_v12, %v2014_v37  ;;  %v1520_v13 = vsel %vm3576_vm9, %v1515_v38, %v1519_v14 }
  0xff   : > { %996 = vst [vmem:[#allocation1 + $0x20] ss:$4 sm:$0xff] %v895_v34  ;;  %v1237_v51 = vshrl.u32 %v1153_v59, 16  ;;  %v1525_v2 = vrot.slane %v1524_v60, 4  ;;  %v629_v27 = vadd.f32 %v3473_v48, %v605_v57  ;;  %v1230_v59 = vor.u32 %v1229_v52, %v1226_v10 }
 0x100   : > { %997 = vst [vmem:[#allocation1 + $0x21] ss:$4 sm:$0xff] %v896_v40  ;;  %v992_v56 = vld.sshfl [vmem:[#allocation1] sm:$0xff pattern:$0x73625140]  ;;  %v1099_v40 = vpack.c.bf16 %v993_v28, %v993_v28  ;;  %v1235_v31 = vrot.slane %v1233_v23, 5  ;;  %v2396_v14 = vunpack.c.l.b16 %v2015_v18  ;;  %v2230_v38 = vunpack.c.l.b16 %v1520_v13 }
 0x101   : > { %998 = vst [vmem:[#allocation1 + $0x22] ss:$4 sm:$0xff] %v897_v44  ;;  %v1476_v34 = vld [vmem:[#allocation2 + $0x20] sm:$0x1]  ;;  %v1098_v63 = vpack.c.bf16 %v992_v56, %v992_v56  ;;  %v1420_v60 = vrot.slane %v1418_v58, 4  ;;  %v1239_v43 = vrot.slane %v1237_v51, 4  ;;  %v1419_v28 = vsel %vm3565_vm8, %v3012_v41, %v1418_v58 }
 0x102   : > { %v3769_v29 = vld [vmem:[#allocation2 + $0x20] sm:$0x1]  ;;  %999 = vst [vmem:[#allocation1 + $0x23] ss:$4 sm:$0xff] %v3541_v24  ;;  %v1719_v25 = vrot.slane %v1476_v34, 5  ;;  %v1527_v37 = vshll.u32 %v1476_v34, 16 }
 0x103   : > { %v2017_v12 = vrot.slane %v3769_v29, 5  ;;  %994 = vst [vmem:[#allocation1] ss:$4 sm:$0xff] %v3535_v17  ;;  %v1166_v44 = vld [vmem:[#allocation2 + $0x20] sm:$0x1]  ;;  %v652_v17 = vmul.f32 %v629_v27, %v573_v7  ;;  %v1231_v18 = vrot.slane %v1230_v59, 4 }
 0x104   : > { %v1720_v48 = vsel %vm3565_vm8, %v1718_v11, %v1719_v25  ;;  %v1529_v10 = vrot.slane %v1527_v37, 5  ;;  %1130 = vst.msk [vmem:[#allocation2 + $0x30] sm:$0xf] %vm1116_vm2, %v1098_v63  ;;  %v1421_v56 = vrot.slane %v1166_v44, 5  ;;  %v1240_v11 = vor.u32 %v1239_v43, %v1235_v31  ;;  %v1764_v34 = vld [vmem:[#allocation2 + $0x18] sm:$0xf] }
 0x105   : > { %v2018_v57 = vsel %vm3565_vm8, %v2016_v19, %v2017_v12  ;;  %v2271_v52 = vunpack.c.l.b16 %v1720_v48  ;;  %1131 = vst.msk [vmem:[#allocation2 + $0x34] sm:$0xf] %vm1116_vm2, %v1099_v40  ;;  %v1243_v13 = vshll.u32 %v1166_v44, 16  ;;  %v923_v63 = vrot.slane %v3746_v45, 4  ;;  %v3788_v7 = vld [vmem:[#allocation2 + $0x28] sm:$0xf] }
 0x106   : > { %v2397_v23 = vunpack.c.l.b16 %v2018_v57  ;;  %v1530_v51 = vsel %vm3576_vm9, %v1525_v2, %v1529_v10  ;;  %v1422_v41 = vsel %vm3565_vm8, %v1420_v60, %v1421_v56  ;;  %v1241_v58 = vrot.slane %v1240_v11, 4  ;;  %v1981_v27 = vld [vmem:[#allocation2 + $0x24] sm:$0xe]  ;;  %v3796_v37 = vld [vmem:[#allocation2 + $0x2c] sm:$0x1] }
 0x107   : > { %v2285_v19 = vpack.c.b16 %v2271_v52, %v2270_v47  ;;  %v2231_v12 = vunpack.c.l.b16 %v1530_v51  ;;  %v1236_v47 = vsel %vm3576_vm9, %v1231_v18, %v1235_v31  ;;  %v1245_v2 = vrot.slane %v1243_v13, 5  ;;  %v3805_v10 = vld [vmem:[#allocation2 + $0x28] sm:$0xf] }
 0x108   : > { %v2412_v25 = vpack.c.b16 %v2397_v23, %v2396_v14  ;;  %v1789_v59 = vshrl.u32 %v1764_v34, 16  ;;  %v3803_v44 = vadd.f32 %v3480_v53, %v652_v17  ;;  %v2144_v60 = vunpack.c.l.b16 %v1419_v28  ;;  %v1677_v53 = vld [vmem:[#allocation2 + $0x24] sm:$0xe] }
 0x109   : > { %v3790_v40 = vld.sshfl [vmem:[#allocation1 + $0x20] sm:$0xff pattern:$0x73625140]  ;;  %2294 = vrot.lane.b32.xlu2 %v2285_v19, %s3313_s18  ;;  %v2245_v43 = vpack.c.b16 %v2231_v12, %v2230_v38  ;;  %v2145_v48 = vunpack.c.l.b16 %v1422_v41  ;;  %v1792_v57 = vshll.u32 %v1764_v34, 16  ;;  %v1246_v31 = vsel %vm3576_vm9, %v1241_v58, %v1245_v2  ;;  %v3179_v41 = vld [vmem:[#allocation2 + $0x24] sm:$0xff] }
 0x10a   : > { %2420 = vrot.lane.b32.xlu0 %v2412_v25, %s3316_s21  ;;  %1005 = vst [vmem:[#allocation1 + $0x20] ss:$4 sm:$0xff] %v901_v6  ;;  %v3800_v14 = vld.sshfl [vmem:[#allocation1] sm:$0xff pattern:$0x73625140]  ;;  %v1791_v38 = vrot.slane %v1789_v59, 4  ;;  %v2104_v28 = vunpack.c.l.b16 %v1236_v47  ;;  %v2105_v23 = vunpack.c.l.b16 %v1246_v31 }
 0x10b   : > { %1001 = vst [vmem:[#allocation1] ss:$4 sm:$0xff] %v898_v49  ;;  %2254 = vrot.lane.b32.xlu1 %v2245_v43, %s3314_s19  ;;  %v1798_v6 = vshll.u32 %v3736_v50, 16  ;;  %v1802_v52 = vshrl.u32 %v3736_v50, 16  ;;  %v1794_v17 = vrot.slane %v1792_v57, 5  ;;  %v1808_v56 = vshll.u32 %v3769_v29, 16 }
 0x10c   : > { %1002 = vst [vmem:[#allocation1 + $0x1] ss:$4 sm:$0xff] %v899_v62  ;;  %v1766_v49 = vld [vmem:[#allocation2 + $0x24] sm:$0xf]  ;;  %v3027_v11 = vrot.slane %v1981_v27, 9  ;;  %v2021_v13 = vrot.slane %v3788_v7, 5  ;;  %v2158_v50 = vpack.c.b16 %v2145_v48, %v2144_v60  ;;  %v2118_v34 = vpack.c.b16 %v2105_v23, %v2104_v28 }
 0x10d   : > { %1003 = vst [vmem:[#allocation1 + $0x2] ss:$4 sm:$0xff] %v900_v54  ;;  %v1800_v51 = vrot.slane %v1798_v6, 5  ;;  %v1804_v18 = vrot.slane %v1802_v52, 4  ;;  %v1795_v19 = vor.u32 %v1794_v17, %v1791_v38  ;;  %v2024_v62 = vrot.slane %v3796_v37, 5 }
 0x10e   : > { %1004 = vst [vmem:[#allocation1 + $0x3] ss:$4 sm:$0xff] %v3558_v4  ;;  %v3822_v25 = vld [vmem:[#allocation2 + $0x2c] sm:$0x1]  ;;  %v2022_v29 = vsel %vm3565_vm8, %v3027_v11, %v2021_v13  ;;  %v2023_v24 = vrot.slane %v2021_v13, 4  ;;  %v1723_v54 = vrot.slane %v3805_v10, 5 }
 0x10f   : > { %v1805_v12 = vor.u32 %v1804_v18, %v1800_v51  ;;  %v1796_v58 = vrot.slane %v1795_v19, 4  ;;  %v1810_v27 = vrot.slane %v1808_v56, 5  ;;  %v3020_v43 = vrot.slane %v1677_v53, 9  ;;  %v1155_v53 = vld [vmem:[#allocation2 + $0x28] sm:$0xf] }
 0x110   : > { %v1813_v47 = vshrl.u32 %v1766_v49, 16  ;;  %v2025_v60 = vsel %vm3565_vm8, %v2023_v24, %v2024_v62  ;;  %v1725_v48 = vrot.slane %v1723_v54, 4  ;;  %v1726_v57 = vrot.slane %v3822_v25, 5  ;;  %v1370_v56 = vld [vmem:[#allocation2 + $0x24] sm:$0xe] }
 0x111   : > { %v3827_v2 = vld.sshfl [vmem:[#allocation1 + $0x20] sm:$0xff pattern:$0x73625140]  ;;  %2168 = vrot.lane.b32.xlu2 %v2158_v50, %s3310_s15  ;;  %v1806_v59 = vrot.slane %v1805_v12, 4  ;;  %v1801_v31 = vsel %vm3576_vm9, %v1796_v58, %v1800_v51  ;;  %v2398_v38 = vunpack.c.l.b16 %v2022_v29  ;;  %v2399_v6 = vunpack.c.l.b16 %v2025_v60  ;;  %v1154_v50 = vld [vmem:[#allocation2 + $0x24] sm:$0xf] }
 0x112   : > { %2128 = vrot.lane.b32.xlu0 %v2118_v34, %s3311_s16  ;;  %1012 = vst [vmem:[#allocation1 + $0x20] ss:$4 sm:$0xff] %v905_v35  ;;  %v1724_v52 = vsel %vm3565_vm8, %v3020_v43, %v1723_v54  ;;  %v1727_v35 = vsel %vm3565_vm8, %v1725_v48, %v1726_v57  ;;  %v1815_v23 = vrot.slane %v1813_v47, 4  ;;  %v1816_v17 = vshll.u32 %v1766_v49, 16 }
 0x113   : > { %1013 = vst [vmem:[#allocation1 + $0x21] ss:$4 sm:$0xff] %v906_v39  ;;  %2216 = vrot.lane.b32.xlu1 %v3179_v41, %s3312_s17  ;;  %v1811_v28 = vsel %vm3576_vm9, %v1806_v59, %v1810_v27  ;;  %v2356_v51 = vunpack.c.l.b16 %v1801_v31  ;;  %v2273_v11 = vunpack.c.l.b16 %v1727_v35  ;;  %v1822_v13 = vshll.u32 %v3788_v7, 16  ;;  %v1167_v41 = vld [vmem:[#allocation2 + $0x2c] sm:$0x1]  ;;  %v3186_v27 = vld [vmem:[#allocation2 + $0x24] sm:$0xff] }
 0x114   : > { %1014 = vst [vmem:[#allocation1 + $0x22] ss:$4 sm:$0xff] %v3616_v36  ;;  %v2357_v18 = vunpack.c.l.b16 %v1811_v28  ;;  %v3853_v34 = vpack.c.b16 %v2399_v6, %v2398_v38  ;;  %v2272_v19 = vunpack.c.l.b16 %v1724_v52  ;;  %v1818_v62 = vrot.slane %v1816_v17, 5 }
 0x115   : > { %1015 = vst [vmem:[#allocation1 + $0x23] ss:$4 sm:$0xff] %v907_v1  ;;  %v3851_v39 = vld.sshfl [vmem:[#allocation1] sm:$0xff pattern:$0x73625140]  ;;  %v1100_v49 = vpack.c.bf16 %v3800_v14, %v3800_v14  ;;  %v4564_v12 = vrot.slane %v3558_v4, 4  ;;  %v1101_v1 = vpack.c.bf16 %v3790_v40, %v3790_v40 }
 0x116   : > { %v2372_v29 = vpack.c.b16 %v2357_v18, %v2356_v51  ;;  %v1824_v24 = vrot.slane %v1822_v13, 5  ;;  %v1826_v54 = vshrl.u32 %v3788_v7, 16  ;;  %v4565_v58 = vrot.slane %v3558_v4, 6  ;;  %1010 = vst [vmem:[#allocation1 + $0x2] ss:$4 sm:$0xff] %v3593_v55  ;;  %v3187_v4 = vld [vmem:[#allocation2 + $0x30] sm:$0xff] }
 0x117   : > { %1008 = vst [vmem:[#allocation1] ss:$4 sm:$0xff] %v4564_v12  ;;  %v1819_v43 = vor.u32 %v1818_v62, %v1815_v23  ;;  %v1832_v47 = vshll.u32 %v3796_v37, 16  ;;  %v3013_v59 = vrot.slane %v1370_v56, 9  ;;  %v1425_v14 = vrot.slane %v1155_v53, 5 }
 0x118   : > { %1009 = vst [vmem:[#allocation1 + $0x1] ss:$4 sm:$0xff] %v4565_v58  ;;  %v2286_v60 = vpack.c.b16 %v2273_v11, %v2272_v19  ;;  %v1828_v48 = vrot.slane %v1826_v54, 4  ;;  %v1248_v57 = vshrl.u32 %v1154_v50, 16  ;;  %v1251_v31 = vshll.u32 %v1154_v50, 16 }
 0x119   : > { %v1463_v7 = vld [vmem:[#allocation2 + $0x24] sm:$0xf]  ;;  %v4566_v38 = vrot.slane %v3593_v55, 2  ;;  %2380 = vrot.lane.b32.xlu2 %v2372_v29, %s3317_s22  ;;  %v1820_v40 = vrot.slane %v1819_v43, 4  ;;  %v1426_v37 = vsel %vm3565_vm8, %v3013_v59, %v1425_v14  ;;  %v1427_v6 = vrot.slane %v1425_v14, 4 }
 0x11a   : > { %2342 = vrot.lane.b32.xlu0 %v3186_v27, %s3315_s20  ;;  %v1428_v52 = vrot.slane %v1167_v41, 5  ;;  %v1829_v28 = vor.u32 %v1828_v48, %v1824_v24  ;;  %v1834_v35 = vrot.slane %v1832_v47, 5  ;;  %v1250_v23 = vrot.slane %v1248_v57, 4  ;;  %1132 = vst.msk [vmem:[#allocation2 + $0x38] sm:$0x1] %vm1119_vm3, %v1100_v49 }
 0x11b   : > { %1011 = vst [vmem:[#allocation1 + $0x3] ss:$4 sm:$0xff] %v4566_v38  ;;  %v1253_v17 = vrot.slane %v1251_v31, 5  ;;  %2344 = vrot.lane.b32.xlu1 %v3187_v4, %s3315_s20  ;;  %v1825_v55 = vsel %vm3576_vm9, %v1820_v40, %v1824_v24  ;;  %v1257_v51 = vshll.u32 %v1155_v53, 16  ;;  %v1261_v18 = vshrl.u32 %v1155_v53, 16 }
 0x11c   : > { %v1429_v56 = vsel %vm3565_vm8, %v1427_v6, %v1428_v52  ;;  %v1830_v11 = vrot.slane %v1829_v28, 4  ;;  %v2146_v13 = vunpack.c.l.b16 %v1426_v37  ;;  %v1267_v29 = vshll.u32 %v1167_v41, 16  ;;  %1133 = vst.msk [vmem:[#allocation2 + $0x3c] sm:$0xf] %vm1116_vm2, %v1101_v1  ;;  %v3881_v14 = vld [vmem:[#allocation2 + $0x34] sm:$0xf] }
 0x11d   : > { %v2147_v50 = vunpack.c.l.b16 %v1429_v56  ;;  %v1254_v19 = vor.u32 %v1253_v17, %v1250_v23  ;;  %v1259_v62 = vrot.slane %v1257_v51, 5  ;;  %v1263_v12 = vrot.slane %v1261_v18, 4  ;;  %v1982_v48 = vld [vmem:[#allocation2 + $0x30] sm:$0xe]  ;;  %v3887_v4 = vld [vmem:[#allocation2 + $0x34] sm:$0xf] }
 0x11e   : > { %v1532_v54 = vshrl.u32 %v1463_v7, 16  ;;  %v1835_v49 = vsel %vm3576_vm9, %v1830_v11, %v1834_v35  ;;  %v2358_v58 = vunpack.c.l.b16 %v1825_v55  ;;  %v1535_v43 = vshll.u32 %v1463_v7, 16  ;;  %v1678_v7 = vld [vmem:[#allocation2 + $0x30] sm:$0xe] }
 0x11f   : > { %v1255_v27 = vrot.slane %v1254_v19, 4  ;;  %v2359_v24 = vunpack.c.l.b16 %v1835_v49  ;;  %v2159_v47 = vpack.c.b16 %v2147_v50, %v2146_v13  ;;  %v1264_v59 = vor.u32 %v1263_v12, %v1259_v62 }
 0x120   : > { %v1534_v53 = vrot.slane %v1532_v54, 4  ;;  %v1537_v41 = vrot.slane %v1535_v43, 5  ;;  %v1541_v31 = vshll.u32 %v3805_v10, 16  ;;  %v1545_v38 = vshrl.u32 %v3805_v10, 16  ;;  %v3180_v54 = vld [vmem:[#allocation2 + $0x30] sm:$0xff] }
 0x121   : > { %v1260_v57 = vsel %vm3576_vm9, %v1255_v27, %v1259_v62  ;;  %2422 = vrot.lane.b32.xlu2 %v3853_v34, %s3316_s21  ;;  %v2373_v1 = vpack.c.b16 %v2359_v24, %v2358_v58  ;;  %v1265_v40 = vrot.slane %v1264_v59, 4  ;;  %v1269_v37 = vrot.slane %v1267_v29, 5  ;;  %v3893_v52 = vld [vmem:[#allocation2 + $0x38] sm:$0x1]  ;;  %v1768_v29 = vld [vmem:[#allocation2 + $0x30] sm:$0xf] }
 0x122   : > { %2296 = vrot.lane.b32.xlu0 %v2286_v60, %s3313_s18  ;;  %v1551_v6 = vshll.u32 %v3822_v25, 16  ;;  %v1538_v28 = vor.u32 %v1537_v41, %v1534_v53  ;;  %v1543_v35 = vrot.slane %v1541_v31, 5  ;;  %v1547_v23 = vrot.slane %v1545_v38, 4  ;;  %v3895_v10 = vld [vmem:[#allocation2 + $0x38] sm:$0x1] }
 0x123   : > { %v3028_v17 = vrot.slane %v1982_v48, 9  ;;  %2382 = vrot.lane.b32.xlu1 %v2373_v1, %s3317_s22  ;;  %v1270_v34 = vsel %vm3576_vm9, %v1265_v40, %v1269_v37  ;;  %v2106_v55 = vunpack.c.l.b16 %v1260_v57  ;;  %v2028_v60 = vrot.slane %v3881_v14, 5  ;;  %v3902_v13 = vld.sshfl [vmem:[#allocation1] sm:$0xff pattern:$0x73625140] }
 0x124   : > { %v2031_v56 = vrot.slane %v3893_v52, 5  ;;  %v2107_v51 = vunpack.c.l.b16 %v1270_v34  ;;  %v1539_v25 = vrot.slane %v1538_v28, 4  ;;  %v1548_v18 = vor.u32 %v1547_v23, %v1543_v35  ;;  %v3914_v57 = vld.sshfl [vmem:[#allocation1 + $0x20] sm:$0xff pattern:$0x73625140] }
 0x125   : > { %v3021_v11 = vrot.slane %v1678_v7, 9  ;;  %v2029_v50 = vsel %vm3565_vm8, %v3028_v17, %v2028_v60  ;;  %v2030_v19 = vrot.slane %v2028_v60, 4  ;;  %v1730_v62 = vrot.slane %v3887_v4, 5  ;;  %1018 = vst [vmem:[#allocation1] ss:$4 sm:$0xff] %v908_v61 }
 0x126   : > { %v1733_v12 = vrot.slane %v3895_v10, 5  ;;  %v2119_v49 = vpack.c.b16 %v2107_v51, %v2106_v55  ;;  %v1544_v58 = vsel %vm3576_vm9, %v1539_v25, %v1543_v35  ;;  %v1549_v27 = vrot.slane %v1548_v18, 4  ;;  %1020 = vst [vmem:[#allocation1 + $0x20] ss:$4 sm:$0xff] %v909_v8  ;;  %v3933_v55 = vld [vmem:[#allocation2 + $0x34] sm:$0xf] }
 0x127   : > { %v1553_v43 = vrot.slane %v1551_v6, 5  ;;  %v2032_v24 = vsel %vm3565_vm8, %v2030_v19, %v2031_v56  ;;  %v2400_v59 = vunpack.c.l.b16 %v2029_v50  ;;  %v1731_v53 = vsel %vm3565_vm8, %v3021_v11, %v1730_v62  ;;  %v1465_v6 = vld [vmem:[#allocation2 + $0x30] sm:$0xf]  ;;  %1021 = vst [vmem:[#allocation1 + $0x21] ss:$4 sm:$0xff] %v3639_v46 }
 0x128   : > { %v1732_v48 = vrot.slane %v1730_v62, 4  ;;  %v2232_v31 = vunpack.c.l.b16 %v1544_v58  ;;  %v2401_v38 = vunpack.c.l.b16 %v2032_v24  ;;  %v1837_v7 = vshrl.u32 %v1768_v29, 16  ;;  %1022 = vst [vmem:[#allocation1 + $0x22] ss:$4 sm:$0xff] %v910_v22  ;;  %v3939_v19 = vld [vmem:[#allocation2 + $0x38] sm:$0x1] }
 0x129   : > { %v1554_v41 = vsel %vm3576_vm9, %v1549_v27, %v1553_v43  ;;  %2218 = vrot.lane.b32.xlu2 %v3180_v54, %s3312_s17  ;;  %v1840_v37 = vshll.u32 %v1768_v29, 16  ;;  %v1846_v61 = vshll.u32 %v3881_v14, 16  ;;  %v2274_v35 = vunpack.c.l.b16 %v1731_v53  ;;  %1023 = vst [vmem:[#allocation1 + $0x23] ss:$4 sm:$0xff] %v911_v20  ;;  %v809_v53 = vpop.permute.xlu0 %808 }
 0x12a   : > { %2170 = vrot.lane.b32.xlu0 %v2159_v47, %s3310_s15  ;;  %v2233_v1 = vunpack.c.l.b16 %v1554_v41  ;;  %v1734_v40 = vsel %vm3565_vm8, %v1732_v48, %v1733_v12  ;;  %v2414_v28 = vpack.c.b16 %v2401_v38, %v2400_v59  ;;  %v1839_v23 = vrot.slane %v1837_v7, 4 }
 0x12b   : > { %v1850_v36 = vshrl.u32 %v3881_v14, 16  ;;  %2130 = vrot.lane.b32.xlu1 %v2119_v49, %s3311_s16  ;;  %v2275_v8 = vunpack.c.l.b16 %v1734_v40  ;;  %v1842_v47 = vrot.slane %v1840_v37, 5  ;;  %v1848_v17 = vrot.slane %v1846_v61, 5  ;;  %v1371_v14 = vld [vmem:[#allocation2 + $0x30] sm:$0xe] }
 0x12c   : > { %v1856_v34 = vshll.u32 %v3893_v52, 16  ;;  %v2246_v60 = vpack.c.b16 %v2233_v1, %v2232_v31  ;;  %v1556_v51 = vshrl.u32 %v1465_v6, 16  ;;  %v1559_v25 = vshll.u32 %v1465_v6, 16  ;;  %v3942_v54 = vld.sshfl [vmem:[#allocation1] sm:$0xff pattern:$0x73625140] }
 0x12d   : > { %v1852_v56 = vrot.slane %v1850_v36, 4  ;;  %v1843_v18 = vor.u32 %v1842_v47, %v1839_v23  ;;  %v1565_v22 = vshll.u32 %v3887_v4, 16  ;;  %v1569_v50 = vshrl.u32 %v3887_v4, 16  ;;  %1025 = vst [vmem:[#allocation1] ss:$4 sm:$0xff] %v912_v33 }
 0x12e   : > { %v1858_v11 = vrot.slane %v1856_v34, 5  ;;  %v1558_v52 = vrot.slane %v1556_v51, 4  ;;  %v1561_v12 = vrot.slane %v1559_v25, 5  ;;  %v1575_v29 = vshll.u32 %v3895_v10, 16  ;;  %1026 = vst [vmem:[#allocation1 + $0x1] ss:$4 sm:$0xff] %v3676_v26 }
 0x12f   : > { %v1853_v62 = vor.u32 %v1852_v56, %v1848_v17  ;;  %v1844_v20 = vrot.slane %v1843_v18, 4  ;;  %v1567_v49 = vrot.slane %v1565_v22, 5  ;;  %v1571_v58 = vrot.slane %v1569_v50, 4  ;;  %v1156_v33 = vld [vmem:[#allocation2 + $0x30] sm:$0xf] }
 0x130   : > { %v3014_v27 = vrot.slane %v1371_v14, 9  ;;  %v2287_v43 = vpack.c.b16 %v2275_v8, %v2274_v35  ;;  %v1562_v59 = vor.u32 %v1561_v12, %v1558_v52  ;;  %v1432_v4 = vrot.slane %v3933_v55, 5  ;;  %1027 = vst [vmem:[#allocation1 + $0x2] ss:$4 sm:$0xff] %v913_v32  ;;  %v1158_v14 = vld [vmem:[#allocation2 + $0x3c] sm:$0xf] }
 0x131   : > { %v1854_v24 = vrot.slane %v1853_v62, 4  ;;  %2256 = vrot.lane.b32.xlu2 %v2246_v60, %s3314_s19  ;;  %v1849_v10 = vsel %vm3576_vm9, %v1844_v20, %v1848_v17  ;;  %v1572_v48 = vor.u32 %v1571_v58, %v1567_v49  ;;  %v1577_v41 = vrot.slane %v1575_v29, 5  ;;  %1028 = vst [vmem:[#allocation1 + $0x3] ss:$4 sm:$0xff] %v914_v0  ;;  %v1770_v62 = vld [vmem:[#allocation2 + $0x3c] sm:$0xf] }
 0x132   : > { %2424 = vrot.lane.b32.xlu0 %v2414_v28, %s3316_s21  ;;  %v1435_v46 = vrot.slane %v3939_v19, 5  ;;  %v3956_v31 = vmul.f32 %v809_v53, %v3803_v44  ;;  %v1563_v7 = vrot.slane %v1562_v59, 4  ;;  %v1433_v1 = vsel %vm3565_vm8, %v3014_v27, %v1432_v4  ;;  %v3964_v40 = vld.sshfl [vmem:[#allocation1 + $0x20] sm:$0xff pattern:$0x73625140]  ;;  %v2125_v53 = vpop.permute.xlu2 %2124 }
 0x133   : > { %v1859_v38 = vsel %vm3576_vm9, %v1854_v24, %v1858_v11  ;;  %2298 = vrot.lane.b32.xlu1 %v2287_v43, %s3313_s18  ;;  %v2360_v37 = vunpack.c.l.b16 %v1849_v10  ;;  %v1573_v32 = vrot.slane %v1572_v48, 4  ;;  %v1434_v6 = vrot.slane %v1432_v4, 4  ;;  %1029 = vst [vmem:[#allocation1 + $0x20] ss:$4 sm:$0xff] %v915_v15  ;;  %v1372_v27 = vld [vmem:[#allocation2 + $0x3c] sm:$0xe] }
 0x134   : > { %v2361_v61 = vunpack.c.l.b16 %v1859_v38  ;;  %v1568_v44 = vsel %vm3576_vm9, %v1563_v7, %v1567_v49  ;;  %v2148_v28 = vunpack.c.l.b16 %v1433_v1  ;;  %v1272_v35 = vshrl.u32 %v1156_v33, 16 }
 0x135   : > { %v1275_v23 = vshll.u32 %v1156_v33, 16  ;;  %v1578_v0 = vsel %vm3576_vm9, %v1573_v32, %v1577_v41  ;;  %v2234_v8 = vunpack.c.l.b16 %v1568_v44  ;;  %v1436_v47 = vsel %vm3565_vm8, %v1434_v6, %v1435_v46 }
 0x136   : > { %v2374_v36 = vpack.c.b16 %v2361_v61, %v2360_v37  ;;  %v2235_v17 = vunpack.c.l.b16 %v1578_v0  ;;  %v2149_v34 = vunpack.c.l.b16 %v1436_v47  ;;  %v1274_v60 = vrot.slane %v1272_v35, 4  ;;  %v4014_v47 = vld [vmem:[#allocation2 + $0x3c] sm:$0xe] }
 0x137   : > { %v1277_v56 = vrot.slane %v1275_v23, 5  ;;  %v1281_v26 = vshll.u32 %v3933_v55, 16  ;;  %v1285_v15 = vshrl.u32 %v3933_v55, 16  ;;  %v1291_v51 = vshll.u32 %v3939_v19, 16 }
 0x138   : > { %v1102_v25 = vpack.c.bf16 %v3851_v39, %v3851_v39  ;;  %v924_v18 = vrot.slane %v3746_v45, 6  ;;  %v2247_v11 = vpack.c.b16 %v2235_v17, %v2234_v8  ;;  %v1103_v50 = vpack.c.bf16 %v3827_v2, %v3827_v2  ;;  %v3169_v2 = vld [vmem:[#allocation2] sm:$0xff]  ;;  %v3993_v4 = vld.sshfl [vmem:[#allocation1] sm:$0xff pattern:$0x73625140] }
 0x139   : > { %v1278_v22 = vor.u32 %v1277_v56, %v1274_v60  ;;  %v925_v52 = vrot.slane %v3956_v31, 2  ;;  %2384 = vrot.lane.b32.xlu2 %v2374_v36, %s3317_s22  ;;  %v2160_v12 = vpack.c.b16 %v2149_v34, %v2148_v28  ;;  %v1283_v55 = vrot.slane %v1281_v26, 5  ;;  %1032 = vst [vmem:[#allocation1] ss:$4 sm:$0xff] %v3697_v42 }
 0x13a   : > { %v1287_v29 = vrot.slane %v1285_v15, 4  ;;  %1134 = vst.msk [vmem:[#allocation2 + $0x40] sm:$0xf] %vm1116_vm2, %v1102_v25  ;;  %2258 = vrot.lane.b32.xlu0 %v2247_v11, %s3314_s19  ;;  %v1293_v19 = vrot.slane %v1291_v51, 5  ;;  %v1296_v20 = vshrl.u32 %v1158_v14, 16  ;;  %v1299_v49 = vshll.u32 %v1158_v14, 16 }
 0x13b   : > { %v1279_v39 = vrot.slane %v1278_v22, 4  ;;  %1135 = vst.msk [vmem:[#allocation2 + $0x44] sm:$0x1] %vm1119_vm3, %v1103_v50  ;;  %2172 = vrot.lane.b32.xlu1 %v2160_v12, %s3310_s15  ;;  %v1104_v43 = vpack.c.bf16 %v3902_v13, %v3902_v13  ;;  %v1105_v24 = vpack.c.bf16 %v3914_v57, %v3914_v57  ;;  %v1861_v59 = vshrl.u32 %v1770_v62, 16  ;;  %v1983_v13 = vld [vmem:[#allocation2 + $0x3c] sm:$0xe] }
 0x13c   : > { %v1288_v58 = vor.u32 %v1287_v29, %v1283_v55  ;;  %v1298_v10 = vrot.slane %v1296_v20, 4  ;;  %v1301_v48 = vrot.slane %v1299_v49, 5  ;;  %v1864_v41 = vshll.u32 %v1770_v62, 16  ;;  %1033 = vst [vmem:[#allocation1 + $0x1] ss:$4 sm:$0xff] %v916_v30 }
 0x13d   : > { %v926_v46 = vrot.slane %v3956_v31, 4  ;;  %v1284_v33 = vsel %vm3576_vm9, %v1279_v39, %v1283_v55  ;;  %1136 = vst.msk [vmem:[#allocation2 + $0x48] sm:$0xf] %vm1116_vm2, %v1104_v43  ;;  %v1106_v57 = vpack.c.bf16 %v3942_v54, %v3942_v54  ;;  %v927_v7 = vrot.slane %v3956_v31, 6 }
 0x13e   : > { %v1289_v38 = vrot.slane %v1288_v58, 4  ;;  %v1302_v1 = vor.u32 %v1301_v48, %v1298_v10  ;;  %1137 = vst.msk [vmem:[#allocation2 + $0x4c] sm:$0xf] %vm1116_vm2, %v1105_v24  ;;  %v1863_v37 = vrot.slane %v1861_v59, 4  ;;  %v1866_v61 = vrot.slane %v1864_v41, 5 }
 0x13f   : > { %v4005_v32 = vsel %vm2436_vm10, %v3169_v2, %v2125_v53  ;;  %v3015_v44 = vrot.slane %v1372_v27, 9  ;;  %1138 = vst.msk [vmem:[#allocation2 + $0x50] sm:$0x1] %vm1119_vm3, %v1106_v57  ;;  %v1107_v28 = vpack.c.bf16 %v3964_v40, %v3964_v40  ;;  %v2108_v54 = vunpack.c.l.b16 %v1284_v33  ;;  %v4032_v10 = vld.sshfl [vmem:[#allocation1 + $0x20] sm:$0xff pattern:$0x73625140] }
 0x140   : > { %v1294_v6 = vsel %vm3576_vm9, %v1289_v38, %v1293_v19  ;;  %v3029_v0 = vrot.slane %v1983_v13, 9  ;;  %v1108_v8 = vpack.c.bf16 %v3993_v4, %v3993_v4  ;;  %v1303_v60 = vrot.slane %v1302_v1, 4  ;;  %1034 = vst [vmem:[#allocation1 + $0x2] ss:$4 sm:$0xff] %v917_v3 }
 0x141   : > { %v2109_v35 = vunpack.c.l.b16 %v1294_v6  ;;  %v3181_v23 = vld [vmem:[#allocation2 + $0x3c] sm:$0xff]  ;;  %v1867_v11 = vor.u32 %v1866_v61, %v1863_v37  ;;  %1139 = vst.msk [vmem:[#allocation2 + $0x54] sm:$0xf] %vm1116_vm2, %v1107_v28  ;;  %v3022_v19 = vrot.slane %v4014_v47, 9 }
 0x142   : > { %v1159_v36 = vld [vmem:[#allocation2 + $0x40] sm:$0xf]  ;;  %v1169_v17 = vld [vmem:[#allocation2 + $0x44] sm:$0x1]  ;;  %2220 = vrot.lane.b32.xlu0 %v3181_v23, %s3312_s17  ;;  %1140 = vst.msk [vmem:[#allocation2 + $0x58] sm:$0xf] %vm1116_vm2, %v1108_v8  ;;  %v1109_v8 = vpack.c.bf16 %v4032_v10, %v4032_v10 }
 0x143   : > { %v1439_v34 = vrot.slane %v1159_v36, 5  ;;  %v1305_v56 = vshll.u32 %v1159_v36, 16  ;;  %v1309_v26 = vshrl.u32 %v1159_v36, 16  ;;  %v2120_v15 = vpack.c.b16 %v2109_v35, %v2108_v54  ;;  %v1771_v25 = vld [vmem:[#allocation2 + $0x40] sm:$0xf] }
 0x144   : > { %v1442_v51 = vrot.slane %v1169_v17, 5  ;;  %v1315_v40 = vshll.u32 %v1169_v17, 16  ;;  %v1783_v14 = vld [vmem:[#allocation2 + $0x44] sm:$0x1]  ;;  %v2035_v39 = vrot.slane %v1771_v25, 5  ;;  %v4028_v4 = vrot.slane %v1867_v11, 4 }
 0x145   : > { %v1440_v22 = vsel %vm3565_vm8, %v3015_v44, %v1439_v34  ;;  %v1441_v50 = vrot.slane %v1439_v34, 4  ;;  %v1307_v62 = vrot.slane %v1305_v56, 5  ;;  %v1311_v12 = vrot.slane %v1309_v26, 4  ;;  %2132 = vrot.lane.b32.xlu2 %v2120_v15, %s3311_s16  ;;  %v1680_v27 = vld [vmem:[#allocation2 + $0x48] sm:$0xe]  ;;  %v3188_v1 = vld [vmem:[#allocation2 + $0x3c] sm:$0xff] }
 0x146   : > { %v2150_v55 = vunpack.c.l.b16 %v1440_v22  ;;  %v1317_v29 = vrot.slane %v1315_v40, 5  ;;  %v2038_v58 = vrot.slane %v1783_v14, 5  ;;  %v2036_v24 = vsel %vm3565_vm8, %v3029_v0, %v2035_v39  ;;  %v4030_v53 = vld [vmem:[#allocation2 + $0x4c] sm:$0xf]  ;;  %v4034_v13 = vld [vmem:[#allocation2 + $0x50] sm:$0x1]  ;;  %v2165_v56 = vpop.permute.xlu0 %2164 }
 0x147   : > { %v1443_v20 = vsel %vm3565_vm8, %v1441_v50, %v1442_v51  ;;  %v1308_v49 = vsel %vm3576_vm9, %v1303_v60, %v1307_v62  ;;  %v1312_v2 = vor.u32 %v1311_v12, %v1307_v62  ;;  %v2037_v59 = vrot.slane %v2035_v39, 4  ;;  %v4038_v44 = vld [vmem:[#allocation2 + $0x4c] sm:$0xf]  ;;  %v4042_v36 = vld [vmem:[#allocation2 + $0x50] sm:$0x1] }
 0x148   : > { %v2151_v43 = vunpack.c.l.b16 %v1443_v20  ;;  %v2402_v41 = vunpack.c.l.b16 %v2036_v24  ;;  %v1870_v33 = vshll.u32 %v1771_v25, 16  ;;  %v1874_v38 = vshrl.u32 %v1771_v25, 16  ;;  %v1373_v26 = vld [vmem:[#allocation2 + $0x48] sm:$0xe]  ;;  %1036 = vst [vmem:[#allocation1 + $0x20] ss:$4 sm:$0xff] %v3733_v16 }
 0x149   : > { %v1313_v48 = vrot.slane %v1312_v2, 4  ;;  %v2039_v37 = vsel %vm3565_vm8, %v2037_v59, %v2038_v58  ;;  %v1880_v61 = vshll.u32 %v1783_v14, 16  ;;  %v3023_v6 = vrot.slane %v1680_v27, 9  ;;  %v1469_v25 = vld [vmem:[#allocation2 + $0x48] sm:$0xf] }
 0x14a   : > { %v2161_v57 = vpack.c.b16 %v2151_v43, %v2150_v55  ;;  %v2403_v54 = vunpack.c.l.b16 %v2039_v37  ;;  %v1872_v35 = vrot.slane %v1870_v33, 5  ;;  %v1876_v23 = vrot.slane %v1874_v38, 4  ;;  %v1160_v43 = vld [vmem:[#allocation2 + $0x48] sm:$0xf]  ;;  %v4080_v33 = vpop.permute.xlu2 %2166  ;;  %1141 = vst.msk [vmem:[#allocation2 + $0x5c] sm:$0x1] %vm1119_vm3, %v1109_v8 }
 0x14b   : > { %v1318_v28 = vsel %vm3576_vm9, %v1313_v48, %v1317_v29  ;;  %v2110_v0 = vunpack.c.l.b16 %v1308_v49  ;;  %v1744_v34 = vrot.slane %v4030_v53, 5  ;;  %v1747_v60 = vrot.slane %v4034_v13, 5 }
 0x14c   : > { %2174 = vrot.lane.b32.xlu1 %v2161_v57, %s3310_s15  ;;  %v2111_v17 = vunpack.c.l.b16 %v1318_v28  ;;  %v2415_v15 = vpack.c.b16 %v2403_v54, %v2402_v41  ;;  %v1877_v51 = vor.u32 %v1876_v23, %v1872_v35  ;;  %v1882_v40 = vrot.slane %v1880_v61, 5  ;;  %v3182_v61 = vld [vmem:[#allocation2 + $0x48] sm:$0xff] }
 0x14d   : > { %2346 = vrot.lane.b32.xlu2 %v3188_v1, %s3315_s20  ;;  %v1873_v11 = vsel %vm3576_vm9, %v4028_v4, %v1872_v35  ;;  %v1745_v30 = vsel %vm3565_vm8, %v3023_v6, %v1744_v34  ;;  %v1746_v22 = vrot.slane %v1744_v34, 4  ;;  %v4567_v50 = vrot.slane %v3697_v42, 6 }
 0x14e   : > { %v2121_v14 = vpack.c.b16 %v2111_v17, %v2110_v0  ;;  %v1878_v62 = vrot.slane %v1877_v51, 4  ;;  %v2463_v3 = vsel %vm2461_vm11, %v4005_v32, %v2165_v56  ;;  %v3016_v12 = vrot.slane %v1373_v26, 9 }
 0x14f   : > { %1035 = vst [vmem:[#allocation1 + $0x3] ss:$4 sm:$0xff] %v4567_v50  ;;  %v1446_v55 = vrot.slane %v4038_v44, 5  ;;  %v1748_v29 = vsel %vm3565_vm8, %v1746_v22, %v1747_v60  ;;  %v1449_v39 = vrot.slane %v4042_v36, 5  ;;  %v1604_v20 = vshrl.u32 %v1469_v25, 16  ;;  %v2213_v8 = vpop.permute.xlu1 %2212 }
 0x150   : > { %2134 = vrot.lane.b32.xlu0 %v2121_v14, %s3311_s16  ;;  %v1607_v49 = vshll.u32 %v1469_v25, 16  ;;  %v4568_v42 = vrot.slane %v3733_v16, 2  ;;  %v1883_v32 = vsel %vm3576_vm9, %v1878_v62, %v1882_v40  ;;  %v2278_v2 = vunpack.c.l.b16 %v1745_v30 }
 0x151   : > { %v2279_v58 = vunpack.c.l.b16 %v1748_v29  ;;  %v1447_v27 = vsel %vm3565_vm8, %v3016_v12, %v1446_v55  ;;  %v4569_v24 = vrot.slane %v3733_v16, 4  ;;  %v2363_v59 = vunpack.c.l.b16 %v1883_v32 }
 0x152   : > { %1037 = vst [vmem:[#allocation1 + $0x21] ss:$4 sm:$0xff] %v4568_v42  ;;  %v1448_v4 = vrot.slane %v1446_v55, 4  ;;  %v1606_v10 = vrot.slane %v1604_v20, 4  ;;  %v1609_v48 = vrot.slane %v1607_v49, 5  ;;  %v4570_v41 = vrot.slane %v3733_v16, 6 }
 0x153   : > { %1038 = vst [vmem:[#allocation1 + $0x22] ss:$4 sm:$0xff] %v4569_v24  ;;  %v2362_v38 = vunpack.c.l.b16 %v1873_v11  ;;  %v2152_v57 = vunpack.c.l.b16 %v1447_v27  ;;  %v1613_v1 = vshll.u32 %v4030_v53, 16  ;;  %v1617_v37 = vshrl.u32 %v4030_v53, 16  ;;  %v4100_v49 = vld [vmem:[#allocation2 + $0x58] sm:$0xf] }
 0x154   : > { %1039 = vst [vmem:[#allocation1 + $0x23] ss:$4 sm:$0xff] %v4570_v41  ;;  %2426 = vrot.lane.b32.xlu1 %v2415_v15, %s3316_s21  ;;  %v2289_v6 = vpack.c.b16 %v2279_v58, %v2278_v2  ;;  %v1450_v28 = vsel %vm3565_vm8, %v1448_v4, %v1449_v39  ;;  %v1610_v54 = vor.u32 %v1609_v48, %v1606_v10  ;;  %v1623_v16 = vshll.u32 %v4034_v13, 16  ;;  %v1681_v2 = vld [vmem:[#allocation2 + $0x54] sm:$0xe] }
 0x155   : > { %v1615_v35 = vrot.slane %v1613_v1, 5  ;;  %v1619_v23 = vrot.slane %v1617_v37, 4  ;;  %v1320_v0 = vshrl.u32 %v1160_v43, 16  ;;  %v1323_v17 = vshll.u32 %v1160_v43, 16  ;;  %2222 = vrot.lane.b32.xlu2 %v3182_v61, %s3312_s17  ;;  %v4108_v43 = vld [vmem:[#allocation2 + $0x58] sm:$0xf] }
 0x156   : > { %v2375_v34 = vpack.c.b16 %v2363_v59, %v2362_v38  ;;  %v1611_v53 = vrot.slane %v1610_v54, 4  ;;  %v1625_v60 = vrot.slane %v1623_v16, 5  ;;  %v1329_v56 = vshll.u32 %v4038_v44, 16  ;;  %v1040_v26 = vld.sshfl [vmem:[#allocation1] sm:$0xff pattern:$0x73625140]  ;;  %v2253_v59 = vpop.permute.xlu2 %2252 }
 0x157   : > { %v1620_v15 = vor.u32 %v1619_v23, %v1615_v35  ;;  %v1322_v51 = vrot.slane %v1320_v0, 4  ;;  %v1325_v40 = vrot.slane %v1323_v17, 5  ;;  %v1333_v25 = vshrl.u32 %v4038_v44, 16  ;;  %1042 = vst [vmem:[#allocation1] ss:$4 sm:$0xff] %v3746_v45 }
 0x158   : > { %2386 = vrot.lane.b32.xlu0 %v2375_v34, %s3317_s22  ;;  %v2153_v13 = vunpack.c.l.b16 %v1450_v28  ;;  %v1331_v14 = vrot.slane %v1329_v56, 5  ;;  %v1339_v11 = vshll.u32 %v4042_v36, 16  ;;  %v1616_v30 = vsel %vm3576_vm9, %v1611_v53, %v1615_v35  ;;  %v2588_v24 = vld [vmem:[%s4555_s3 + $0x20] sm:$0xf]  ;;  %v4116_v10 = vld [vmem:[#allocation2 + $0x5c] sm:$0x1] }
 0x159   : > { %v1621_v22 = vrot.slane %v1620_v15, 4  ;;  %v1326_v50 = vor.u32 %v1325_v40, %v1322_v51  ;;  %v1335_v62 = vrot.slane %v1333_v25, 4  ;;  %v2480_v44 = vsel %vm2478_vm12, %v2463_v3, %v2213_v8  ;;  %v1985_v1 = vld [vmem:[#allocation2 + $0x54] sm:$0xe] }
 0x15a   : > { %v1341_v55 = vrot.slane %v1339_v11, 5  ;;  %v1110_v29 = vpack.c.bf16 %v1040_v26, %v1040_v26  ;;  %v4571_v20 = vrot.slane %v3746_v45, 2  ;;  %v2162_v3 = vpack.c.b16 %v2153_v13, %v2152_v57  ;;  %v4125_v57 = vld [vmem:[#allocation2 + $0x5c] sm:$0x1]  ;;  %v1774_v35 = vld [vmem:[#allocation2 + $0x54] sm:$0xf] }
 0x15b   : > { %v1041_v12 = vld.sshfl [vmem:[#allocation1 + $0x20] sm:$0xff pattern:$0x73625140]  ;;  %v1626_v36 = vsel %vm3576_vm9, %v1621_v22, %v1625_v60  ;;  %v1327_v42 = vrot.slane %v1326_v50, 4  ;;  %v1336_v32 = vor.u32 %v1335_v62, %v1331_v14  ;;  %v2238_v58 = vunpack.c.l.b16 %v1616_v30  ;;  %v1162_v13 = vld [vmem:[#allocation2 + $0x54] sm:$0xf] }
 0x15c   : > { %v1111_v39 = vpack.c.bf16 %v1041_v12, %v1041_v12  ;;  %1044 = vst [vmem:[#allocation1 + $0x20] ss:$4 sm:$0xff] %v4571_v20  ;;  %2302 = vrot.lane.b32.xlu1 %v2289_v6, %s3313_s18  ;;  %v2239_v27 = vunpack.c.l.b16 %v1626_v36  ;;  %v1751_v48 = vrot.slane %v4100_v49, 5  ;;  %v4123_v38 = vsel %vm2495_vm13, %v2480_v44, %v2253_v59  ;;  %v3190_v15 = vld [vmem:[#allocation2 + $0x54] sm:$0xff]  ;;  %v2293_v59 = vpop.permute.xlu0 %2292 }
 0x15d   : > { %1045 = vst [vmem:[#allocation1 + $0x21] ss:$4 sm:$0xff] %v923_v63  ;;  %v1332_v4 = vsel %vm3576_vm9, %v1327_v42, %v1331_v14  ;;  %v1337_v63 = vrot.slane %v1336_v32, 4  ;;  %2176 = vrot.lane.b32.xlu2 %v2162_v3, %s3310_s15  ;;  %v3024_v61 = vrot.slane %v1681_v2, 9  ;;  %v2049_v28 = vrot.slane %v4108_v43, 5  ;;  %v3196_v22 = vld [vmem:[%s4555_s3 + $0x18] sm:$0xff] }
 0x15e   : > { %1142 = vst.msk [vmem:[#allocation2 + $0x60] sm:$0xf] %vm1116_vm2, %v1110_v29  ;;  %v2249_v41 = vpack.c.b16 %v2239_v27, %v2238_v58  ;;  %v1753_v6 = vrot.slane %v1751_v48, 4  ;;  %v2112_v54 = vunpack.c.l.b16 %v1332_v4  ;;  %v2639_v16 = vunpack.c.l.b16 %v2588_v24  ;;  %v4133_v23 = vld.sshfl [vmem:[#allocation1] sm:$0xff pattern:$0x73625140] }
 0x15f   : > { %1143 = vst.msk [vmem:[#allocation2 + $0x64] sm:$0xf] %vm1116_vm2, %v1111_v39  ;;  %v1342_v37 = vsel %vm3576_vm9, %v1337_v63, %v1341_v55  ;;  %v4137_v0 = vsel %vm3565_vm8, %v3024_v61, %v1751_v48  ;;  %v3031_v17 = vrot.slane %v1985_v1, 9  ;;  %v2051_v34 = vrot.slane %v2049_v28, 4  ;;  %v1163_v50 = vld [vmem:[#allocation2 + $0x58] sm:$0xf] }
 0x160   : > { %1046 = vst [vmem:[#allocation1 + $0x22] ss:$4 sm:$0xff] %v924_v18  ;;  %2262 = vrot.lane.b32.xlu0 %v2249_v41, %s3314_s19  ;;  %v2113_v45 = vunpack.c.l.b16 %v1342_v37  ;;  %v1754_v18 = vrot.slane %v4116_v10, 5  ;;  %v2052_v56 = vrot.slane %v4125_v57, 5  ;;  %v2644_v26 = vpack.c.b16 %v2639_v16, %v2639_v16  ;;  %v1171_v32 = vld [vmem:[#allocation2 + $0x5c] sm:$0x1] }
 0x161   : > { %1047 = vst [vmem:[#allocation1 + $0x23] ss:$4 sm:$0xff] %v3956_v31  ;;  %v2050_v51 = vsel %vm3565_vm8, %v3031_v17, %v2049_v28  ;;  %v1909_v40 = vshrl.u32 %v1774_v35, 16  ;;  %v1912_v25 = vshll.u32 %v1774_v35, 16  ;;  %v1918_v8 = vshll.u32 %v4108_v43, 16  ;;  %v3195_v37 = vld [vmem:[%s4555_s3 + $0x10] sm:$0xff] }
 0x162   : > { %1049 = vst [vmem:[#allocation1] ss:$4 sm:$0xff] %v925_v52  ;;  %v2122_v53 = vpack.c.b16 %v2113_v45, %v2112_v54  ;;  %v1755_v60 = vsel %vm3565_vm8, %v1753_v6, %v1754_v18  ;;  %v3183_v52 = vld [vmem:[#allocation2 + $0x54] sm:$0xff]  ;;  %v2280_v14 = vunpack.c.l.b16 %v4137_v0  ;;  %v2053_v11 = vsel %vm3565_vm8, %v2051_v34, %v2052_v56 }
 0x163   : > { %1050 = vst [vmem:[#allocation1 + $0x1] ss:$4 sm:$0xff] %v926_v46  ;;  %v2668_v30 = vsel %vm2666_vm15, %v2644_v26, 0  ;;  %v1922_v46 = vshrl.u32 %v4108_v43, 16  ;;  %v4158_v62 = vpop.permute.xlu2 %2294  ;;  %v4160_v12 = vpop.permute.xlu1 %2126  ;;  %v1911_v55 = vrot.slane %v1909_v40, 4  ;;  %v1914_v44 = vrot.slane %v1912_v25, 5 }
 0x164   : > { %2136 = vrot.lane.b32.xlu1 %v2122_v53, %s3311_s16  ;;  %2673 = vmatpush.bf16.msra.mxu1 %v2668_v30  ;;  %v1920_v29 = vrot.slane %v1918_v8, 5  ;;  %v1928_v39 = vshll.u32 %v4125_v57, 16  ;;  %1051 = vst [vmem:[#allocation1 + $0x2] ss:$4 sm:$0xff] %v927_v7  ;;  %v2281_v20 = vunpack.c.l.b16 %v1755_v60  ;;  %v2406_v36 = vunpack.c.l.b16 %v2050_v51  ;;  %v1374_v24 = vld [vmem:[#allocation2 + $0x54] sm:$0xe] }
 0x165   : > { %3203 = vmatpush.bf16.msrb.mxu3 %v2668_v30  ;;  %2350 = vrot.lane.b32.xlu2 %v3190_v15, %s3315_s20  ;;  %v1924_v42 = vrot.slane %v1922_v46, 4  ;;  %v1344_v2 = vshrl.u32 %v1162_v13, 16  ;;  %1052 = vst [vmem:[#allocation1 + $0x3] ss:$4 sm:$0xff] %v3560_v5  ;;  %v2407_v3 = vunpack.c.l.b16 %v2053_v11  ;;  %v1915_v58 = vor.u32 %v1914_v44, %v1911_v55  ;;  %v1471_v17 = vld [vmem:[#allocation2 + $0x54] sm:$0xf] }
 0x166   : > { %v1347_v27 = vshll.u32 %v1162_v13, 16  ;;  %v1353_v43 = vshll.u32 %v1163_v50, 16  ;;  %v1930_v7 = vrot.slane %v1928_v39, 5  ;;  %v1357_v63 = vshrl.u32 %v1163_v50, 16  ;;  %v3184_v61 = vld [vmem:[#allocation2 + $0x60] sm:$0xff] }
 0x167   : > { %v1925_v31 = vor.u32 %v1924_v42, %v1920_v29  ;;  %v1346_v4 = vrot.slane %v1344_v2, 4  ;;  %v1916_v48 = vrot.slane %v1915_v58, 4  ;;  %v1363_v1 = vshll.u32 %v1171_v32, 16  ;;  %v3194_v25 = vld [vmem:[%s4555_s3 + $0x8] sm:$0xff] }
 0x168   : > { %2224 = vrot.lane.b32.xlu0 %v3183_v52, %s3312_s17  ;;  %2674 = vmatpush.bf16.msra.mxu1 %v3196_v22  ;;  %v1349_v41 = vrot.slane %v1347_v27, 5  ;;  %v1355_v57 = vrot.slane %v1353_v43, 5  ;;  %v1359_v28 = vrot.slane %v1357_v63, 4  ;;  %v3017_v54 = vrot.slane %v1374_v24, 9 }
 0x169   : > { %3204 = vmatpush.bf16.msrb.mxu3 %v3196_v22  ;;  %v1926_v6 = vrot.slane %v1925_v31, 4  ;;  %v1453_v45 = vrot.slane %v1163_v50, 5  ;;  %v2514_v18 = vsel %vm2512_vm14, %v4123_v38, %v2293_v59  ;;  %v2290_v16 = vpack.c.b16 %v2281_v20, %v2280_v14  ;;  %v4190_v50 = vld [vmem:[#allocation2 + $0x40] sm:$0xf]  ;;  %v4195_v20 = vld [vmem:[#allocation2 + $0x44] sm:$0x1] }
 0x16a   : > { %v1921_v35 = vsel %vm3576_vm9, %v1916_v48, %v1920_v29  ;;  %v1350_v0 = vor.u32 %v1349_v41, %v1346_v4  ;;  %v2417_v34 = vpack.c.b16 %v2407_v3, %v2406_v36  ;;  %v1360_v60 = vor.u32 %v1359_v28, %v1355_v57  ;;  %v3193_v3 = vld [vmem:[%s4555_s3] sm:$0xff]  ;;  %v1986_v59 = vld [vmem:[#allocation2 + $0x60] sm:$0xe]  ;;  %v4205_v31 = vpop.permute.xlu0 %2214  ;;  %v1777_v48 = vld [vmem:[#allocation2 + $0x64] sm:$0xf] }
 0x16b   : > { %v1931_v53 = vsel %vm3576_vm9, %v1926_v6, %v1930_v7  ;;  %v1454_v56 = vsel %vm3565_vm8, %v3017_v54, %v1453_v45  ;;  %v4180_v26 = vpop.permute.xlu2 %2168  ;;  %v1455_v51 = vrot.slane %v1453_v45, 4  ;;  %v1456_v40 = vrot.slane %v1171_v32, 5  ;;  %v1776_v45 = vld [vmem:[#allocation2 + $0x60] sm:$0xf] }
 0x16c   : > { %2226 = vrot.lane.b32.xlu1 %v3184_v61, %s3312_s17  ;;  %v2367_v15 = vunpack.c.l.b16 %v1931_v53  ;;  %v1351_v38 = vrot.slane %v1350_v0, 4  ;;  %2675 = vmatpush.bf16.msra.mxu1 %v3195_v37  ;;  %v2366_v8 = vunpack.c.l.b16 %v1921_v35  ;;  %v1361_v13 = vrot.slane %v1360_v60, 4  ;;  %v2341_v22 = vpop.permute.xlu1 %2340  ;;  %v4219_v35 = vld [vmem:[#allocation2 + $0x64] sm:$0xf] }
 0x16d   : > { %3205 = vmatpush.bf16.msrb.mxu3 %v3195_v37  ;;  %2304 = vrot.lane.b32.xlu2 %v2290_v16, %s3313_s18  ;;  %v1365_v52 = vrot.slane %v1363_v1, 5  ;;  %v1628_v14 = vshrl.u32 %v1471_v17, 16  ;;  %v1457_v30 = vsel %vm3565_vm8, %v1455_v51, %v1456_v40  ;;  %v2154_v46 = vunpack.c.l.b16 %v1454_v56  ;;  %v1048_v53 = vld.sshfl [vmem:[#allocation1 + $0x20] sm:$0xff pattern:$0x73625140] }
 0x16e   : > { %v1356_v11 = vsel %vm3576_vm9, %v1351_v38, %v1355_v57  ;;  %v2377_v55 = vpack.c.b16 %v2367_v15, %v2366_v8  ;;  %v2155_v29 = vunpack.c.l.b16 %v1457_v30  ;;  %v1631_v42 = vshll.u32 %v1471_v17, 16  ;;  %v1467_v8 = vld [vmem:[#allocation2 + $0x3c] sm:$0xf] }
 0x16f   : > { %v1366_v44 = vsel %vm3576_vm9, %v1361_v13, %v1365_v52  ;;  %v1630_v39 = vrot.slane %v1628_v14, 4  ;;  %v1637_v32 = vshll.u32 %v4100_v49, 16  ;;  %v1641_v2 = vshrl.u32 %v4100_v49, 16 }
 0x170   : > { %2430 = vrot.lane.b32.xlu0 %v2417_v34, %s3316_s21  ;;  %v2115_v36 = vunpack.c.l.b16 %v1366_v44  ;;  %2676 = vmatpush.bf16.msra.mxu1 %v3194_v25  ;;  %v2114_v58 = vunpack.c.l.b16 %v1356_v11  ;;  %v2531_v27 = vsel %vm2529_vm0, %v2514_v18, %v2341_v22  ;;  %v1647_v43 = vshll.u32 %v4116_v10, 16 }
 0x171   : > { %3206 = vmatpush.bf16.msrb.mxu3 %v3194_v25  ;;  %v1737_v24 = vrot.slane %v4190_v50, 5  ;;  %v1633_v7 = vrot.slane %v1631_v42, 5  ;;  %v1639_v4 = vrot.slane %v1637_v32, 5  ;;  %v1643_v63 = vrot.slane %v1641_v2, 4 }
 0x172   : > { %v1740_v49 = vrot.slane %v4195_v20, 5  ;;  %v2123_v41 = vpack.c.b16 %v2115_v36, %v2114_v58  ;;  %v1112_v1 = vpack.c.bf16 %v4133_v23, %v4133_v23  ;;  %v2163_v37 = vpack.c.b16 %v2155_v29, %v2154_v46  ;;  %v1682_v23 = vld [vmem:[#allocation2 + $0x60] sm:$0xe] }
 0x173   : > { %v1738_v57 = vsel %vm3565_vm8, %v3022_v19, %v1737_v24  ;;  %v1739_v10 = vrot.slane %v1737_v24, 4  ;;  %v2381_v61 = vpop.permute.xlu2 %2380  ;;  %v1634_v6 = vor.u32 %v1633_v7, %v1630_v39  ;;  %v1644_v28 = vor.u32 %v1643_v63, %v1639_v4  ;;  %v3191_v24 = vld [vmem:[#allocation2 + $0x60] sm:$0xff] }
 0x174   : > { %2390 = vrot.lane.b32.xlu1 %v2377_v55, %s3317_s22  ;;  %2677 = vmatpush.bf16.msra.mxu1 %v3193_v3  ;;  %v3032_v54 = vrot.slane %v1986_v59, 9  ;;  %v1649_v18 = vrot.slane %v1647_v43, 5  ;;  %v2276_v16 = vunpack.c.l.b16 %v1738_v57  ;;  %1144 = vst.msk [vmem:[#allocation2 + $0x68] sm:$0x1] %vm1119_vm3, %v1112_v1  ;;  %v2056_v19 = vrot.slane %v1777_v48, 5 }
 0x175   : > { %3207 = vmatpush.bf16.msrb.mxu3 %v3193_v3  ;;  %2138 = vrot.lane.b32.xlu2 %v2123_v41, %s3311_s16  ;;  %v1741_v47 = vsel %vm3565_vm8, %v1739_v10, %v1740_v49  ;;  %v1635_v0 = vrot.slane %v1634_v6, 4  ;;  %v1645_v17 = vrot.slane %v1644_v28, 4  ;;  %v1933_v15 = vshrl.u32 %v1776_v45, 16  ;;  %s2941_s16 = sshll.u32 %s4586_s25, 5 }
 0x176   : > { %v2277_v34 = vunpack.c.l.b16 %v1741_v47  ;;  %v2057_v60 = vsel %vm3565_vm8, %v3032_v54, %v2056_v19  ;;  %v2058_v56 = vrot.slane %v2056_v19, 4  ;;  %v4572_v38 = vrot.slane %v3560_v5, 2 }
 0x177   : > { %v1640_v51 = vsel %vm3576_vm9, %v1635_v0, %v1639_v4  ;;  %v1650_v40 = vsel %vm3576_vm9, %v1645_v17, %v1649_v18  ;;  %v1935_v14 = vrot.slane %v1933_v15, 4  ;;  %v1936_v11 = vshll.u32 %v1776_v45, 16  ;;  %v1473_v0 = vld [vmem:[#allocation2 + $0x60] sm:$0xf] }
 0x178   : > { %2178 = vrot.lane.b32.xlu0 %v2163_v37, %s3310_s15  ;;  %1053 = vst [vmem:[#allocation1 + $0x20] ss:$4 sm:$0xff] %v4572_v38  ;;  %v2288_v25 = vpack.c.b16 %v2277_v34, %v2276_v16  ;;  %v2240_v13 = vunpack.c.l.b16 %v1640_v51  ;;  %v2241_v52 = vunpack.c.l.b16 %v1650_v40  ;;  %v1942_v30 = vshll.u32 %v1777_v48, 16  ;;  %s2940_s15 = sshll.u32 %s4584_s24, 4 }
 0x179   : > { %v1946_v46 = vshrl.u32 %v1777_v48, 16  ;;  %v3025_v22 = vrot.slane %v1682_v23, 9  ;;  %v1758_v55 = vrot.slane %v4219_v35, 5  ;;  %v1938_v44 = vrot.slane %v1936_v11, 5 }
 0x17a   : > { %v2250_v5 = vpack.c.b16 %v2241_v52, %v2240_v13  ;;  %v1580_v29 = vshrl.u32 %v1467_v8, 16  ;;  %v1583_v39 = vshll.u32 %v1467_v8, 16  ;;  %v2548_v32 = vsel %vm2546_vm1, %v2531_v27, %v2381_v61 }
 0x17b   : > { %v1786_v42 = vld [vmem:[#allocation2 + $0x68] sm:$0x1]  ;;  %v1944_v2 = vrot.slane %v1942_v30, 5  ;;  %v1948_v3 = vrot.slane %v1946_v46, 4  ;;  %v1113_v43 = vpack.c.bf16 %v1048_v53, %v1048_v53  ;;  %v1939_v4 = vor.u32 %v1938_v44, %v1935_v14  ;;  %v4237_v49 = vpop.permute.xlu2 %2422 }
 0x17c   : > { %v2421_v36 = vpop.permute.xlu0 %2420  ;;  %v4232_v58 = vld [vmem:[#allocation2 + $0x68] sm:$0x1]  ;;  %2264 = vrot.lane.b32.xlu1 %v2250_v5, %s3314_s19  ;;  %v2059_v59 = vrot.slane %v1786_v42, 5  ;;  %v1952_v63 = vshll.u32 %v1786_v42, 16  ;;  %v2408_v48 = vunpack.c.l.b16 %v2057_v60  ;;  %v1760_v57 = vrot.slane %v1758_v55, 4 }
 0x17d   : > { %2300 = vrot.lane.b32.xlu2 %v2288_v25, %s3313_s18  ;;  %v2565_v7 = vsel %vm2563_vm4, %v2548_v32, %v2421_v36  ;;  %v4240_v27 = vpop.permute.xlu1 %2254  ;;  %v1949_v41 = vor.u32 %v1948_v3, %v1944_v2  ;;  %v1761_v10 = vrot.slane %v4232_v58, 5  ;;  %v1940_v37 = vrot.slane %v1939_v4, 4  ;;  %1145 = vst.msk [vmem:[#allocation2 + $0x6c] sm:$0xf] %vm1116_vm2, %v1113_v43 }
 0x17e   : > { %3146 = vmatmul.msk.bf16.vlgmr.msra.gmra.mxu1 %vm2649_vm5, %v2565_v7  ;;  %v2060_v1 = vsel %vm3565_vm8, %v2058_v56, %v2059_v59  ;;  %v1954_v61 = vrot.slane %v1952_v63, 5  ;;  %v1759_v6 = vsel %vm3565_vm8, %v3025_v22, %v1758_v55  ;;  %v1582_v18 = vrot.slane %v1580_v29, 4  ;;  %v1054_v22 = vld.sshfl [vmem:[#allocation1] sm:$0xff pattern:$0x73625140]  ;;  %v3170_v29 = vld [vmem:[#allocation2 + $0xc] sm:$0xff] }
 0x17f   : > { %v2409_v28 = vunpack.c.l.b16 %v2060_v1  ;;  %v1950_v54 = vrot.slane %v1949_v41, 4  ;;  %v1762_v45 = vsel %vm3565_vm8, %v1760_v57, %v1761_v10  ;;  %v1945_v47 = vsel %vm3576_vm9, %v1940_v37, %v1944_v2  ;;  %v1055_v44 = vld.sshfl [vmem:[#allocation1 + $0x20] sm:$0xff pattern:$0x73625140] }
 0x180   : > { %2352 = vrot.lane.b32.xlu0 %v3191_v24, %s3315_s20  ;;  %v2283_v16 = vunpack.c.l.b16 %v1762_v45  ;;  %v1585_v19 = vrot.slane %v1583_v39, 5  ;;  %v1589_v23 = vshll.u32 %v4190_v50, 16  ;;  %v2282_v53 = vunpack.c.l.b16 %v1759_v6 }
 0x181   : > { %v2418_v17 = vpack.c.b16 %v2409_v28, %v2408_v48  ;;  %v1955_v34 = vsel %vm3576_vm9, %v1950_v54, %v1954_v61  ;;  %v1593_v60 = vshrl.u32 %v4190_v50, 16  ;;  %v2368_v56 = vunpack.c.l.b16 %v1945_v47  ;;  %v1772_v48 = vld [vmem:[#allocation2 + $0x48] sm:$0xf]  ;;  %v4278_v28 = vld [vmem:[#allocation2 + $0x4c] sm:$0xf] }
 0x182   : > { %v2369_v15 = vunpack.c.l.b16 %v1955_v34  ;;  %v1586_v38 = vor.u32 %v1585_v19, %v1582_v18  ;;  %v1591_v51 = vrot.slane %v1589_v23, 5  ;;  %v1599_v8 = vshll.u32 %v4195_v20, 16  ;;  %v4288_v34 = vld [vmem:[#allocation2 + $0x50] sm:$0x1] }
 0x183   : > { %v1595_v25 = vrot.slane %v1593_v60, 4  ;;  %v1652_v13 = vshrl.u32 %v1473_v0, 16  ;;  %v1655_v52 = vshll.u32 %v1473_v0, 16  ;;  %v2291_v11 = vpack.c.b16 %v2283_v16, %v2282_v53  ;;  %v4268_v32 = vpop.permute.xlu2 %2218 }
 0x184   : > { %v4257_v40 = vpop.permute.xlu0 %2128  ;;  %2432 = vrot.lane.b32.xlu1 %v2418_v17, %s3316_s21  ;;  %v2378_v14 = vpack.c.b16 %v2369_v15, %v2368_v56  ;;  %v1587_v30 = vrot.slane %v1586_v38, 4  ;;  %v1661_v46 = vshll.u32 %v4219_v35, 16  ;;  %v1601_v39 = vrot.slane %v1599_v8, 5  ;;  %v1778_v42 = vld [vmem:[#allocation2 + $0x6c] sm:$0xf] }
 0x185   : > { %v1596_v50 = vor.u32 %v1595_v25, %v1591_v51  ;;  %v4262_v55 = vpop.permute.xlu1 %2216  ;;  %v1654_v5 = vrot.slane %v1652_v13, 4  ;;  %v1657_v36 = vrot.slane %v1655_v52, 5  ;;  %v1665_v43 = vshrl.u32 %v4219_v35, 16 }
 0x186   : > { %2392 = vrot.lane.b32.xlu2 %v2378_v14, %s3317_s22  ;;  %v1592_v20 = vsel %vm3576_vm9, %v1587_v30, %v1591_v51  ;;  %v1663_v3 = vrot.slane %v1661_v46, 5  ;;  %v1671_v24 = vshll.u32 %v4232_v58, 16  ;;  %v2442_v59 = vsel %vm2436_vm10, %v3170_v29, %v4160_v12 }
 0x187   : > { %v1597_v2 = vrot.slane %v1596_v50, 4  ;;  %v1658_v7 = vor.u32 %v1657_v36, %v1654_v5  ;;  %v1114_v4 = vpack.c.bf16 %v1054_v22, %v1054_v22  ;;  %v1115_v63 = vpack.c.bf16 %v1055_v44, %v1055_v44 }
 0x188   : > { %2306 = vrot.lane.b32.xlu0 %v2291_v11, %s3313_s18  ;;  %v1667_v57 = vrot.slane %v1665_v43, 4  ;;  %v1957_v10 = vshrl.u32 %v1778_v42, 16  ;;  %v1960_v1 = vshll.u32 %v1778_v42, 16  ;;  %v2236_v37 = vunpack.c.l.b16 %v1592_v20  ;;  %s4373_s18 = sadd.s32 %s2941_s16, %s2940_s15 }
 0x189   : > { %v1602_v41 = vsel %vm3576_vm9, %v1597_v2, %v1601_v39  ;;  %v1659_v6 = vrot.slane %v1658_v7, 4  ;;  %1146 = vst.msk [vmem:[#allocation2 + $0x70] sm:$0xf] %vm1116_vm2, %v1114_v4  ;;  %v1673_v58 = vrot.slane %v1671_v24, 5  ;;  %v1885_v54 = vshrl.u32 %v1772_v48, 16 }
 0x18a   : > { %v2237_v61 = vunpack.c.l.b16 %v1602_v41  ;;  %v1668_v35 = vor.u32 %v1667_v57, %v1663_v3  ;;  %1147 = vst.msk [vmem:[#allocation2 + $0x74] sm:$0x1] %vm1119_vm3, %v1115_v63  ;;  %v2465_v45 = vsel %vm2461_vm11, %v2442_v59, %v4080_v33  ;;  %v1959_v23 = vrot.slane %v1957_v10, 4  ;;  %v1987_v33 = vld [vmem:[#allocation2 + $0x6c] sm:$0xe] }
 0x18b   : > { %v1664_v47 = vsel %vm3576_vm9, %v1659_v6, %v1663_v3  ;;  %v2482_v16 = vsel %vm2478_vm12, %v2465_v45, %v4205_v31  ;;  %v1962_v0 = vrot.slane %v1960_v1, 5  ;;  %v1888_v60 = vshll.u32 %v1772_v48, 16 }
 0x18c   : > { %v2343_v12 = vpop.permute.xlu0 %2342  ;;  %v2248_v18 = vpack.c.b16 %v2237_v61, %v2236_v37  ;;  %v1669_v19 = vrot.slane %v1668_v35, 4  ;;  %v2499_v53 = vsel %vm2495_vm13, %v2482_v16, %v4240_v27  ;;  %v1894_v56 = vshll.u32 %v4278_v28, 16  ;;  %v4297_v27 = vpop.permute.xlu2 %2256  ;;  %v1984_v61 = vld [vmem:[#allocation2 + $0x48] sm:$0xe] }
 0x18d   : > { %v4286_v17 = vpop.permute.xlu1 %2344  ;;  %v1898_v15 = vshrl.u32 %v4278_v28, 16  ;;  %v2242_v38 = vunpack.c.l.b16 %v1664_v47  ;;  %v1887_v51 = vrot.slane %v1885_v54, 4  ;;  %v1890_v8 = vrot.slane %v1888_v60, 5 }
 0x18e   : > { %2260 = vrot.lane.b32.xlu1 %v2248_v18, %s3314_s19  ;;  %v1674_v31 = vsel %vm3576_vm9, %v1669_v19, %v1673_v58  ;;  %v1896_v13 = vrot.slane %v1894_v56, 5  ;;  %v1963_v11 = vor.u32 %v1962_v0, %v1959_v23  ;;  %v2516_v30 = vsel %vm2512_vm14, %v2499_v53, %v4158_v62  ;;  %v3171_v56 = vld [vmem:[#allocation2 + $0x18] sm:$0xff] }
 0x18f   : > { %v2243_v25 = vunpack.c.l.b16 %v1674_v31  ;;  %v1900_v52 = vrot.slane %v1898_v15, 4  ;;  %v3033_v46 = vrot.slane %v1987_v33, 9  ;;  %v1904_v22 = vshll.u32 %v4288_v34, 16 }
 0x190   : > { %v1779_v14 = vld [vmem:[#allocation2 + $0x70] sm:$0xf]  ;;  %v2533_v36 = vsel %vm2529_vm0, %v2516_v30, %v2343_v12  ;;  %v1891_v2 = vor.u32 %v1890_v8, %v1887_v51  ;;  %v2042_v57 = vrot.slane %v4278_v28, 5  ;;  %v1964_v10 = vrot.slane %v1963_v11, 4 }
 0x191   : > { %v2251_v50 = vpack.c.b16 %v2243_v25, %v2242_v38  ;;  %v1787_v5 = vld [vmem:[#allocation2 + $0x74] sm:$0x1]  ;;  %v1966_v44 = vshll.u32 %v1779_v14, 16  ;;  %v1970_v29 = vshrl.u32 %v1779_v14, 16  ;;  %v2063_v20 = vrot.slane %v1779_v14, 5  ;;  %v3192_v59 = vld [vmem:[#allocation2 + $0x6c] sm:$0xff] }
 0x192   : > { %v1976_v39 = vshll.u32 %v1787_v5, 16  ;;  %v1901_v3 = vor.u32 %v1900_v52, %v1896_v13  ;;  %v2066_v7 = vrot.slane %v1787_v5, 5  ;;  %v1892_v63 = vrot.slane %v1891_v2, 4  ;;  %v3189_v5 = vld [vmem:[#allocation2 + $0x48] sm:$0xff] }
 0x193   : > { %2266 = vrot.lane.b32.xlu2 %v2251_v50, %s3314_s19  ;;  %v1968_v43 = vrot.slane %v1966_v44, 5  ;;  %v1972_v24 = vrot.slane %v1970_v29, 4  ;;  %v2065_v62 = vrot.slane %v2063_v20, 4  ;;  %v2064_v4 = vsel %vm3565_vm8, %v3033_v46, %v2063_v20  ;;  %s2942_s19 = sshll.u32 %s4373_s18, 3 }
 0x194   : > { %v2297_v42 = vpop.permute.xlu0 %2296  ;;  %v1906_v48 = vrot.slane %v1904_v22, 5  ;;  %v2045_v6 = vrot.slane %v4288_v34, 5  ;;  %v1978_v35 = vrot.slane %v1976_v39, 5  ;;  %v1897_v12 = vsel %vm3576_vm9, %v1892_v63, %v1896_v13  ;;  %v2385_v38 = vpop.permute.xlu2 %2384  ;;  %v3173_v39 = vld [vmem:[#allocation2 + $0x30] sm:$0xff]  ;;  %s4383_s25 = scalar_lea.vmem %s4558_s6, %s2942_s19  ;;  %s4413_s14 = scalar_lea.vmem %s4559_s7, %s2942_s19 }
 0x195   : > { %v2383_v41 = vpop.permute.xlu1 %2382  ;;  %v1973_v1 = vor.u32 %v1972_v24, %v1968_v43  ;;  %v2067_v37 = vsel %vm3565_vm8, %v2065_v62, %v2066_v7  ;;  %v1902_v54 = vrot.slane %v1901_v3, 4  ;;  %v1969_v45 = vsel %vm3576_vm9, %v1964_v10, %v1968_v43 }
 0x196   : > { %2354 = vrot.lane.b32.xlu1 %v3192_v59, %s3315_s20  ;;  %v2411_v58 = vunpack.c.l.b16 %v2067_v37  ;;  %v2410_v18 = vunpack.c.l.b16 %v2064_v4  ;;  %v2550_v47 = vsel %vm2546_vm1, %v2533_v36, %v2383_v41  ;;  %v2364_v19 = vunpack.c.l.b16 %v1897_v12 }
 0x197   : > { %v1974_v28 = vrot.slane %v1973_v1, 4  ;;  %v1907_v16 = vsel %vm3576_vm9, %v1902_v54, %v1906_v48  ;;  %v3030_v23 = vrot.slane %v1984_v61, 9  ;;  %v2044_v0 = vrot.slane %v2042_v57, 4 }
 0x198   : > { %v2419_v53 = vpack.c.b16 %v2411_v58, %v2410_v18  ;;  %v2365_v33 = vunpack.c.l.b16 %v1907_v16  ;;  %v2567_v60 = vsel %vm2563_vm4, %v2550_v47, %v4237_v49  ;;  %v2370_v15 = vunpack.c.l.b16 %v1969_v45 }
 0x199   : > { %v1979_v34 = vsel %vm3576_vm9, %v1974_v28, %v1978_v35  ;;  %v2046_v51 = vsel %vm3565_vm8, %v2044_v0, %v2045_v6  ;;  %3147 = vmatmul.msk.bf16.gmra.mxu1 %vm2649_vm5, %v2567_v60  ;;  %v2445_v21 = vsel %vm2436_vm10, %v3171_v56, %v4257_v40  ;;  %v2043_v49 = vsel %vm3565_vm8, %v3030_v23, %v2042_v57 }
 0x19a   : > { %v2371_v31 = vunpack.c.l.b16 %v1979_v34  ;;  %v2376_v8 = vpack.c.b16 %v2365_v33, %v2364_v19  ;;  %v2405_v14 = vunpack.c.l.b16 %v2046_v51  ;;  %v2467_v11 = vsel %vm2461_vm11, %v2445_v21, %v4180_v26 }
 0x19b   : > { %2434 = vrot.lane.b32.xlu2 %v2419_v53, %s3316_s21  ;;  %v2404_v30 = vunpack.c.l.b16 %v2043_v49  ;;  %v2484_v46 = vsel %vm2478_vm12, %v2467_v11, %v4262_v55  ;;  %vm2605_vm2 = vcmask 31744  }
 0x19c   : > { %v2171_v25 = vpop.permute.xlu0 %2170  ;;  %v2379_v13 = vpack.c.b16 %v2371_v31, %v2370_v15  ;;  %v2501_v40 = vsel %vm2495_vm13, %v2484_v46, %v4297_v27 }
 0x19d   : > { %v2131_v52 = vpop.permute.xlu1 %2130  ;;  %v2416_v22 = vpack.c.b16 %v2405_v14, %v2404_v30  ;;  %v2518_v9 = vsel %vm2512_vm14, %v2501_v40, %v2297_v42  ;;  %v2589_v40 = vld [vmem:[%s4383_s25] sm:$0xff] }
 0x19e   : > { %2388 = vrot.lane.b32.xlu1 %v2376_v8, %s3317_s22  ;;  %2394 = vrot.lane.b32.xlu0 %v2379_v13, %s3317_s22  ;;  %v2535_v20 = vsel %vm2529_vm0, %v2518_v9, %v4286_v17  ;;  %v3172_v17 = vld [vmem:[#allocation2 + $0x24] sm:$0xff] }
 0x19f   : > { %v2133_v44 = vpop.permute.xlu2 %2132  ;;  %v2552_v26 = vsel %vm2546_vm1, %v2535_v20, %v2385_v38  ;;  %v2448_v62 = vsel %vm2436_vm10, %v3172_v17, %v2131_v52  ;;  %v3175_v38 = vld [vmem:[#allocation2 + $0x48] sm:$0xff] }
 0x1a0   : > { %v2451_v36 = vsel %vm2436_vm10, %v3173_v39, %v2133_v44  ;;  %v2469_v4 = vsel %vm2461_vm11, %v2448_v62, %v2171_v25  ;;  %v4394_v44 = vld [vmem:[%s4557_s5 + $0x2] ss:$0 sm:$0xff]  ;;  %v2590_v39 = vld [vmem:[%s4383_s25 + $0x8] sm:$0xff] }
 0x1a1   : > { %v2486_v48 = vsel %vm2478_vm12, %v2469_v4, %v4268_v32  ;;  %v3174_v32 = vld [vmem:[#allocation2 + $0x3c] sm:$0xff]  ;;  %v3176_v62 = vld [vmem:[#allocation2 + $0x54] sm:$0xff] }
 0x1a3   : > { %2428 = vrot.lane.b32.xlu2 %v2416_v22, %s3316_s21 }
 0x1a4   : > { %v2425_v50 = vpop.permute.xlu0 %2424 }
 0x1a5   : > { %v2299_v29 = vpop.permute.xlu1 %2298  ;;  %v2569_v55 = vsel %vm2563_vm4, %v2552_v26, %v2425_v50  ;;  %v4399_v26 = vld [vmem:[%s4557_s5 + $0x1] ss:$0 sm:$0xff] }
 0x1a6   : > { %2348 = vrot.lane.b32.xlu0 %v3189_v5, %s3315_s20  ;;  %v2606_v5 = vsel %vm2605_vm2, %v2589_v40, 0.0 }
 0x1a7   : > { %v2347_v3 = vpop.permute.xlu2 %2346 }
 0x1a9   : > { %3148 = vmatmul.msk.bf16.gmra.mxu1 %vm2649_vm5, %v2569_v55 }
 0x1ac   : > { %v2259_v27 = vpop.permute.xlu0 %2258 }
 0x1ad   : > { %v2173_v42 = vpop.permute.xlu1 %2172  ;;  %v2503_v41 = vsel %vm2495_vm13, %v2486_v48, %v2259_v27 }
 0x1ae   : > { %v2471_v2 = vsel %vm2461_vm11, %v2451_v36, %v2173_v42  ;;  %v2520_v1 = vsel %vm2512_vm14, %v2503_v41, %v2299_v29  ;;  %v4407_v36 = vld [vmem:[%s4557_s5] ss:$0 sm:$0xff]  ;;  %v2607_v42 = vsel %vm2605_vm2, %v2590_v39, 0.0 }
 0x1af   : > { %v2223_v59 = vpop.permute.xlu2 %2222  ;;  %v2537_v37 = vsel %vm2529_vm0, %v2520_v1, %v2347_v3 }
 0x1b4   : > { %v2221_v43 = vpop.permute.xlu0 %2220 }
 0x1b5   : > { %v4349_v24 = vsel %vm2478_vm12, %v2471_v2, %v2221_v43 }
 0x1b7   : > { %v2177_v57 = vpop.permute.xlu2 %2176 }
 0x1be   : > { %v2175_v7 = vpop.permute.xlu1 %2174 }
 0x1bf   : > { %v2351_v12 = vpop.permute.xlu2 %2350 }
 0x1c2   : > { %v2135_v63 = vpop.permute.xlu0 %2134 }
 0x1c3   : > { %v2454_v28 = vsel %vm2436_vm10, %v3174_v32, %v2135_v63 }
 0x1c4   : > { %v2473_v16 = vsel %vm2461_vm11, %v2454_v28, %v2175_v7  ;;  %v2591_v28 = vld [vmem:[%s4383_s25 + $0x10] sm:$0xff] }
 0x1c5   : > { %v2490_v23 = vsel %vm2478_vm12, %v2473_v16, %v2223_v59 }
 0x1c6   : > { %v2427_v10 = vpop.permute.xlu1 %2426 }
 0x1c7   : > { %v2305_v18 = vpop.permute.xlu2 %2304 }
 0x1ca   : > { %v2387_v61 = vpop.permute.xlu0 %2386 }
 0x1cb   : > { %v2554_v6 = vsel %vm2546_vm1, %v2537_v37, %v2387_v61 }
 0x1cc   : > { %v2571_v35 = vsel %vm2563_vm4, %v2554_v6, %v2427_v10 }
 0x1cd   : > { %3149 = vmatmul.msk.bf16.gmra.mxu1 %vm2649_vm5, %v2571_v35 }
 0x1ce   : > { %v2303_v58 = vpop.permute.xlu1 %2302 }
 0x1cf   : > { %v2139_v53 = vpop.permute.xlu2 %2138 }
 0x1d0   : > { %v2460_v4 = vsel %vm2436_vm10, %v3176_v62, %v2139_v53 }
 0x1d2   : > { %v2263_v54 = vpop.permute.xlu0 %2262 }
 0x1d3   : > { %v2507_v0 = vsel %vm2495_vm13, %v2490_v23, %v2263_v54 }
 0x1d4   : > { %v2524_v33 = vsel %vm2512_vm14, %v2507_v0, %v2303_v58 }
 0x1d5   : > { %v2541_v60 = vsel %vm2529_vm0, %v2524_v33, %v2351_v12 }
 0x1d6   : > { %v2137_v45 = vpop.permute.xlu1 %2136 }
 0x1d7   : > { %v2457_v25 = vsel %vm2436_vm10, %v3175_v38, %v2137_v45  ;;  %v2301_v8 = vpop.permute.xlu2 %2300 }
 0x1d8   : > { %v2475_v21 = vsel %vm2461_vm11, %v2457_v25, %v2177_v57 }
 0x1da   : > { %v2225_v47 = vpop.permute.xlu0 %2224 }
 0x1db   : > { %v2492_v13 = vsel %vm2478_vm12, %v2475_v21, %v2225_v47  ;;  %v2608_v47 = vsel %vm2605_vm2, %v2591_v28, 0.0  ;;  %v2600_v28 = vld [vmem:[%s4383_s25 + $0x58] sm:$0xff] }
 0x1de   : > { %v2227_v19 = vpop.permute.xlu1 %2226 }
 0x1e0   : > { %v2393_v46 = vpop.permute.xlu2 %2392 }
 0x1e2   : > { %v2431_v34 = vpop.permute.xlu0 %2430 }
 0x1e6   : > { %v2391_v56 = vpop.permute.xlu1 %2390 }
 0x1e7   : > { %v2558_v15 = vsel %vm2546_vm1, %v2541_v60, %v2391_v56 }
 0x1e8   : > { %v2575_v31 = vsel %vm2563_vm4, %v2558_v15, %v2431_v34  ;;  %v2592_v15 = vld [vmem:[%s4383_s25 + $0x18] sm:$0xff] }
 0x1e9   : > { %3151 = vmatmul.msk.bf16.vlgmr.msrb.gmra.mxu3 %vm2649_vm5, %v2575_v31  ;;  %v2609_v38 = vsel %vm2605_vm2, %v2592_v15, 0.0 }
 0x1ea   : > { %v2179_v51 = vpop.permute.xlu0 %2178 }
 0x1eb   : > { %v2477_v48 = vsel %vm2461_vm11, %v2460_v4, %v2179_v51  ;;  %v2596_v4 = vld [vmem:[%s4383_s25 + $0x38] sm:$0xff] }
 0x1ec   : > { %v2494_v1 = vsel %vm2478_vm12, %v2477_v48, %v2227_v19  ;;  %v2613_v48 = vsel %vm2605_vm2, %v2596_v4, 0.0 }
 0x1ed   : > { %v2267_v63 = vpop.permute.xlu2 %2266 }
 0x1ee   : > { %v2265_v49 = vpop.permute.xlu1 %2264  ;;  %v2511_v6 = vsel %vm2495_vm13, %v2494_v1, %v2267_v63 }
 0x1ef   : > { %v2509_v52 = vsel %vm2495_vm13, %v2492_v13, %v2265_v49  ;;  %v2593_v49 = vld [vmem:[%s4383_s25 + $0x20] sm:$0xff] }
 0x1f0   : > { %v2526_v11 = vsel %vm2512_vm14, %v2509_v52, %v2305_v18 }
 0x1f2   : > { %v2353_v14 = vpop.permute.xlu0 %2352 }
 0x1f3   : > { %v2543_v30 = vsel %vm2529_vm0, %v2526_v11, %v2353_v14  ;;  %v2610_v14 = vsel %vm2605_vm2, %v2593_v49, 0.0 }
 0x1f4   : > { %v2560_v9 = vsel %vm2546_vm1, %v2543_v30, %v2393_v46 }
 0x1f5   : > { %v2435_v12 = vpop.permute.xlu2 %2434 }
 0x1f6   : > { %v2433_v22 = vpop.permute.xlu1 %2432 }
 0x1f7   : > { %v2577_v50 = vsel %vm2563_vm4, %v2560_v9, %v2433_v22  ;;  %v2594_v9 = vld [vmem:[%s4383_s25 + $0x28] sm:$0xff] }
 0x1f9   : > { %3152 = vmatmul.msk.bf16.gmra.mxu3 %vm2649_vm5, %v2577_v50 }
 0x1fa   : > { %v2307_v41 = vpop.permute.xlu0 %2306 }
 0x1fb   : > { %v2679_v29 = vpop.f32.mrf.mxu1  ;;  %v2528_v35 = vsel %vm2512_vm14, %v2511_v6, %v2307_v41 }
 0x1fc   : > { %v2680_v20 = vadd.f32 %v2679_v29, %v2606_v5  ;;  %v2611_v5 = vsel %vm2605_vm2, %v2594_v9, 0.0  ;;  %v2597_v9 = vld [vmem:[%s4383_s25 + $0x40] sm:$0xff] }
 0x1fd   : > { %v2429_v33 = vpop.permute.xlu2 %2428 }
 0x1fe   : > { %v2723_v55 = vmul.f32 %v4394_v44, %v2680_v20 }
 0x200   : > { %v2740_v27 = vadd.f32 %v4399_v26, %v2723_v55  ;;  %v2261_v3 = vpop.permute.xlu1 %2260 }
 0x201   : > { %v2505_v18 = vsel %vm2495_vm13, %v4349_v24, %v2261_v3 }
 0x202   : > { %v2756_v2 = vmul.f32 %v2740_v27, %v2680_v20  ;;  %v2522_v23 = vsel %vm2512_vm14, %v2505_v18, %v2301_v8 }
 0x203   : > { %v2681_v43 = vpop.f32.mrf.mxu1 }
 0x204   : > { %v2773_v17 = vadd.f32 %v4407_v36, %v2756_v2  ;;  %v2682_v59 = vadd.f32 %v2681_v43, %v2607_v42  ;;  %v2595_v43 = vld [vmem:[%s4383_s25 + $0x30] sm:$0xff] }
 0x206   : > { %2789 = vst.msk [vmem:[%s4413_s14] sm:$0xff] %vm2436_vm10, %v2773_v17  ;;  %v2724_v7 = vmul.f32 %v4394_v44, %v2682_v59  ;;  %v2612_v17 = vsel %vm2605_vm2, %v2595_v43, 0.0  ;;  %v2598_v43 = vld [vmem:[%s4383_s25 + $0x48] sm:$0xff] }
 0x208   : > { %v2741_v57 = vadd.f32 %v4399_v26, %v2724_v7  ;;  %v2355_v61 = vpop.permute.xlu1 %2354 }
 0x209   : > { %v2545_v58 = vsel %vm2529_vm0, %v2528_v35, %v2355_v61 }
 0x20a   : > { %v2757_v10 = vmul.f32 %v2741_v57, %v2682_v59 }
 0x20c   : > { %v2774_v37 = vadd.f32 %v4407_v36, %v2757_v10 }
 0x20e   : > { %2790 = vst.msk [vmem:[%s4413_s14 + $0x8] sm:$0xff] %vm2436_vm10, %v2774_v37 }
 0x210   : > { %v2395_v54 = vpop.permute.xlu0 %2394  ;;  %v2389_v16 = vpop.permute.xlu1 %2388 }
 0x211   : > { %v2562_v45 = vsel %vm2546_vm1, %v2545_v58, %v2395_v54  ;;  %v2599_v58 = vld [vmem:[%s4383_s25 + $0x50] sm:$0xff] }
 0x212   : > { %v2579_v32 = vsel %vm2563_vm4, %v2562_v45, %v2435_v12  ;;  %v2616_v12 = vsel %vm2605_vm2, %v2599_v58, 0.0 }
 0x213   : > { %3153 = vmatmul.msk.bf16.gmra.mxu3 %vm2649_vm5, %v2579_v32 }
 0x216   : > { %v2684_v19 = vpop.f32.mrf.mxu1 }
 0x217   : > { %v2685_v34 = vadd.f32 %v2684_v19, %v2608_v47  ;;  %v2617_v47 = vsel %vm2605_vm2, %v2600_v28, 0.0 }
 0x218   : > { %v2349_v0 = vpop.permute.xlu0 %2348 }
 0x219   : > { %v2539_v53 = vsel %vm2529_vm0, %v2522_v23, %v2349_v0  ;;  %v2725_v56 = vmul.f32 %v4394_v44, %v2685_v34 }
 0x21a   : > { %v2556_v60 = vsel %vm2546_vm1, %v2539_v53, %v2389_v16  ;;  %v2601_v53 = vld [vmem:[%s4383_s25 + $0x60] sm:$0xff] }
 0x21b   : > { %v2573_v24 = vsel %vm2563_vm4, %v2556_v60, %v2429_v33  ;;  %v2742_v31 = vadd.f32 %v4399_v26, %v2725_v56  ;;  %v2618_v56 = vsel %vm2605_vm2, %v2601_v53, 0.0 }
 0x21c   : > { %3150 = vmatmul.msk.bf16.gmra.mxu1 %vm2649_vm5, %v2573_v24 }
 0x21d   : > { %v2758_v51 = vmul.f32 %v2742_v31, %v2685_v34 }
 0x21e   : > { %v2686_v25 = vpop.f32.mrf.mxu1 }
 0x21f   : > { %v2775_v8 = vadd.f32 %v4407_v36, %v2758_v51  ;;  %v2687_v21 = vadd.f32 %v2686_v25, %v2609_v38  ;;  %v2602_v51 = vld [vmem:[%s4383_s25 + $0x68] sm:$0xff] }
 0x221   : > { %2791 = vst.msk [vmem:[%s4413_s14 + $0x10] sm:$0xff] %vm2436_vm10, %v2775_v8  ;;  %v2726_v13 = vmul.f32 %v4394_v44, %v2687_v21  ;;  %v2619_v8 = vsel %vm2605_vm2, %v2602_v51, 0.0 }
 0x223   : > { %v2743_v52 = vadd.f32 %v4399_v26, %v2726_v13 }
 0x225   : > { %v2759_v11 = vmul.f32 %v2743_v52, %v2687_v21 }
 0x226   : > { %v2689_v30 = vpop.f32.mrf.mxu1 }
 0x227   : > { %v2776_v46 = vadd.f32 %v4407_v36, %v2759_v11  ;;  %v2690_v40 = vadd.f32 %v2689_v30, %v2610_v14 }
 0x229   : > { %2792 = vst.msk [vmem:[%s4413_s14 + $0x18] sm:$0xff] %vm2436_vm10, %v2776_v46  ;;  %v2727_v22 = vmul.f32 %v4394_v44, %v2690_v40 }
 0x22b   : > { %v2744_v50 = vadd.f32 %v4399_v26, %v2727_v22 }
 0x22d   : > { %v2760_v29 = vmul.f32 %v2744_v50, %v2690_v40  ;;  %v2603_v40 = vld [vmem:[%s4383_s25 + $0x70] sm:$0xff] }
 0x22e   : > { %v2691_v20 = vpop.f32.mrf.mxu1  ;;  %v2620_v22 = vsel %vm2605_vm2, %v2603_v40, 0.0 }
 0x22f   : > { %v2777_v55 = vadd.f32 %v4407_v36, %v2760_v29  ;;  %v2692_v39 = vadd.f32 %v2691_v20, %v2611_v5  ;;  %v2614_v29 = vsel %vm2605_vm2, %v2597_v9, 0.0 }
 0x231   : > { %2793 = vst.msk [vmem:[%s4413_s14 + $0x20] sm:$0xff] %vm2436_vm10, %v2777_v55  ;;  %v2728_v27 = vmul.f32 %v4394_v44, %v2692_v39 }
 0x233   : > { %v2745_v42 = vadd.f32 %v4399_v26, %v2728_v27 }
 0x235   : > { %v2761_v2 = vmul.f32 %v2745_v42, %v2692_v39  ;;  %v2604_v39 = vld [vmem:[%s4383_s25 + $0x78] sm:$0xff] }
 0x237   : > { %v2778_v3 = vadd.f32 %v4407_v36, %v2761_v2 }
 0x239   : > { %2794 = vst.msk [vmem:[%s4413_s14 + $0x28] sm:$0xff] %vm2436_vm10, %v2778_v3  ;;  %v2621_v3 = vsel %vm2605_vm2, %v2604_v39, 0.0 }
 0x24a   : > { %v2694_v59 = vpop.f32.mrf.mxu1 }
 0x24b   : > { %v2695_v62 = vadd.f32 %v2694_v59, %v2612_v17 }
 0x24d   : > { %v2729_v7 = vmul.f32 %v4394_v44, %v2695_v62 }
 0x24f   : > { %v2746_v63 = vadd.f32 %v4399_v26, %v2729_v7 }
 0x251   : > { %v2762_v41 = vmul.f32 %v2746_v63, %v2695_v62  ;;  %v2615_v63 = vsel %vm2605_vm2, %v2598_v43, 0.0 }
 0x252   : > { %v2696_v57 = vpop.f32.mrf.mxu1 }
 0x253   : > { %v2779_v10 = vadd.f32 %v4407_v36, %v2762_v41  ;;  %v2697_v1 = vadd.f32 %v2696_v57, %v2613_v48 }
 0x255   : > { %2795 = vst.msk [vmem:[%s4413_s14 + $0x30] sm:$0xff] %vm2436_vm10, %v2779_v10  ;;  %v2730_v37 = vmul.f32 %v4394_v44, %v2697_v1 }
 0x257   : > { %v2747_v61 = vadd.f32 %v4399_v26, %v2730_v37 }
 0x259   : > { %v2763_v6 = vmul.f32 %v2747_v61, %v2697_v1 }
 0x25b   : > { %v2780_v35 = vadd.f32 %v4407_v36, %v2763_v6 }
 0x25d   : > { %2796 = vst.msk [vmem:[%s4413_s14 + $0x38] sm:$0xff] %vm2436_vm10, %v2780_v35 }
 0x26c   : > { %v2704_v54 = vpop.f32.mrf.mxu3 }
 0x26d   : > { %v2705_v45 = vadd.f32 %v2704_v54, %v2616_v12 }
 0x26f   : > { %v2733_v32 = vmul.f32 %v4394_v44, %v2705_v45 }
 0x271   : > { %v2750_v18 = vadd.f32 %v4399_v26, %v2733_v32 }
 0x273   : > { %v2766_v16 = vmul.f32 %v2750_v18, %v2705_v45 }
 0x274   : > { %v2706_v19 = vpop.f32.mrf.mxu3 }
 0x275   : > { %v2783_v23 = vadd.f32 %v4407_v36, %v2766_v16  ;;  %v2707_v0 = vadd.f32 %v2706_v19, %v2617_v47 }
 0x277   : > { %2799 = vst.msk [vmem:[%s4413_s14 + $0x50] sm:$0xff] %vm2436_vm10, %v2783_v23  ;;  %v2734_v34 = vmul.f32 %v4394_v44, %v2707_v0 }
 0x279   : > { %v2751_v33 = vadd.f32 %v4399_v26, %v2734_v34 }
 0x27b   : > { %v2767_v60 = vmul.f32 %v2751_v33, %v2707_v0 }
 0x27c   : > { %v2709_v24 = vpop.f32.mrf.mxu3 }
 0x27d   : > { %v2784_v15 = vadd.f32 %v4407_v36, %v2767_v60  ;;  %v2710_v31 = vadd.f32 %v2709_v24, %v2618_v56 }
 0x27f   : > { %2800 = vst.msk [vmem:[%s4413_s14 + $0x58] sm:$0xff] %vm2436_vm10, %v2784_v15  ;;  %v2735_v38 = vmul.f32 %v4394_v44, %v2710_v31 }
 0x281   : > { %v2752_v25 = vadd.f32 %v4399_v26, %v2735_v38 }
 0x283   : > { %v2768_v21 = vmul.f32 %v2752_v25, %v2710_v31 }
 0x284   : > { %v2711_v13 = vpop.f32.mrf.mxu3 }
 0x285   : > { %v2785_v49 = vadd.f32 %v4407_v36, %v2768_v21  ;;  %v2712_v52 = vadd.f32 %v2711_v13, %v2619_v8 }
 0x287   : > { %2801 = vst.msk [vmem:[%s4413_s14 + $0x60] sm:$0xff] %vm2436_vm10, %v2785_v49  ;;  %v2736_v14 = vmul.f32 %v4394_v44, %v2712_v52 }
 0x289   : > { %v2753_v11 = vadd.f32 %v4399_v26, %v2736_v14 }
 0x28b   : > { %v2769_v30 = vmul.f32 %v2753_v11, %v2712_v52 }
 0x28d   : > { %v2786_v46 = vadd.f32 %v4407_v36, %v2769_v30 }
 0x28f   : > { %2802 = vst.msk [vmem:[%s4413_s14 + $0x68] sm:$0xff] %vm2436_vm10, %v2786_v46 }
 0x296   : > { %v2714_v50 = vpop.f32.mrf.mxu3 }
 0x297   : > { %v2715_v5 = vadd.f32 %v2714_v50, %v2620_v22 }
 0x299   : > { %v2737_v20 = vmul.f32 %v4394_v44, %v2715_v5  ;;  %v2699_v55 = vpop.f32.mrf.mxu1 }
 0x29a   : > { %v2700_v27 = vadd.f32 %v2699_v55, %v2614_v29 }
 0x29b   : > { %v2754_v42 = vadd.f32 %v4399_v26, %v2737_v20 }
 0x29c   : > { %v2731_v2 = vmul.f32 %v4394_v44, %v2700_v27 }
 0x29d   : > { %v2770_v17 = vmul.f32 %v2754_v42, %v2715_v5 }
 0x29e   : > { %v2748_v59 = vadd.f32 %v4399_v26, %v2731_v2  ;;  %v2716_v62 = vpop.f32.mrf.mxu3 }
 0x29f   : > { %v2787_v7 = vadd.f32 %v4407_v36, %v2770_v17  ;;  %v2717_v4 = vadd.f32 %v2716_v62, %v2621_v3 }
 0x2a0   : > { %v2764_v48 = vmul.f32 %v2748_v59, %v2700_v27 }
 0x2a1   : > { %2803 = vst.msk [vmem:[%s4413_s14 + $0x70] sm:$0xff] %vm2436_vm10, %v2787_v7  ;;  %v2738_v41 = vmul.f32 %v4394_v44, %v2717_v4  ;;  %v2701_v57 = vpop.f32.mrf.mxu1 }
 0x2a2   : > { %v2781_v10 = vadd.f32 %v4407_v36, %v2764_v48  ;;  %v2702_v1 = vadd.f32 %v2701_v57, %v2615_v63 }
 0x2a3   : > { %v2755_v37 = vadd.f32 %v4399_v26, %v2738_v41 }
 0x2a4   : > { %2797 = vst.msk [vmem:[%s4413_s14 + $0x40] sm:$0xff] %vm2436_vm10, %v2781_v10  ;;  %v2732_v61 = vmul.f32 %v4394_v44, %v2702_v1 }
 0x2a5   : > { %v2771_v6 = vmul.f32 %v2755_v37, %v2717_v4 }
 0x2a6   : > { %v2749_v35 = vadd.f32 %v4399_v26, %v2732_v61 }
 0x2a7   : > { %v2788_v58 = vadd.f32 %v4407_v36, %v2771_v6 }
 0x2a8   : > { %v2765_v12 = vmul.f32 %v2749_v35, %v2702_v1 }
 0x2a9   : > { %2804 = vst.msk [vmem:[%s4413_s14 + $0x78] sm:$0xff] %vm2436_vm10, %v2788_v58 }
 0x2aa   : > { %v2782_v54 = vadd.f32 %v4407_v36, %v2765_v12 }
 0x2ac   : > { %2798 = vst.msk [vmem:[%s4413_s14 + $0x48] sm:$0xff] %vm2436_vm10, %v2782_v54 }
 0x2ad PF: > { %s17_s28 = sadd.s32 1, %s3307_s28   ;;  %s4573_s24 = smov %s3299_s26 }
 0x2ae   : > { %p14_p7 = scmp.ge.s32.totalorder %s17_s28, 6   ;;  %s4574_s25 = smov %s3303_s27 }
 0x2af   : > { %s4575_s26 = smov %s4578_s29  ;;  %s4576_s27 = smov %s4582_s30 }
 0x2b0   :  { %16 = sbr.rel (!%p14_p7) target bundleno = 3 (0x3), region = 93 }

</bundles_post_ra>
